<compile_context>
chip_gen: v7x
topology: tpu7x:2x2x1
jax: 0.10.0
libtpu: 0.0.40
codegen_flags: <defaults>
</compile_context>

<pallas_src>
import functools

import jax
import jax.numpy as jnp
from jax import lax
from jax.experimental import pallas as pl
from jax.experimental.pallas import tpu as pltpu

K1 = 16                      # conv1 kernel size
K2 = 16                      # conv2 kernel size
C = 20                       # conv1 / conv2 output channels
POOL = 5                     # maxpool kernel == stride
PAD_L, PAD_R = 8, 7
PHB = 24                     # per-phase row block in the fused conv1 weight (8-aligned)
NSH = (K1 - 1) // POOL + 1   # = 4 shifted copies of the phase planes
KK = NSH * POOL              # = 20 rows in the conv1 im2col slab
PH_TAIL = NSH - 1            # = 3 extra tail columns per phase plane
BN_EPS = 1e-5

_VMEM_BUDGET = 16 << 20      # per-block live-set budget (headroom under the
                             # 32 MiB scoped default; v7x has 64 MiB physical)


def _round_up(a, b):
    return (a + b - 1) // b * b


def _bytes_per_col(cdt_bytes, out_bytes):
    """Rough per-W5-column VMEM live set of one grid step."""
    return (2 * POOL * cdt_bytes      # double-buffered input block
            + KK * cdt_bytes          # conv1 im2col slab
            + POOL * PHB * 4          # fused conv1 result (f32)
            + 2 * C * 4               # pooled / phase-max temps (f32)
            + C * cdt_bytes           # pad scratch
            + 2 * C * 4               # conv2 f32 accumulator temps
            + 2 * C * out_bytes)      # double-buffered output block


def _pick_block_b(N, S5, block_b, cdt_bytes, out_bytes):
    """Samples per grid step: multiple of 8, VMEM-budgeted, >=2 steps when
    the batch allows it without giving up 128-lane alignment of W5."""
    n8 = _round_up(max(N, 1), 8)
    B = min(_round_up(block_b, 8), n8)
    b_cap = max(8, (_VMEM_BUDGET // _bytes_per_col(cdt_bytes, out_bytes) // S5) // 8 * 8)
    B = min(B, b_cap)
    if n8 <= B and n8 >= 256:         # single step but big batch: split in two
        B = min(B, max(128, (n8 // 2) // 128 * 128))
    return B


def se_branch_kernel(x_ref, w1_ref, w2_ref, st_ref, mask_ref, o_ref, pad_ref, *, W5):
    """One block of B samples (W5 = B * S5 columns).

    x_ref   : (1, POOL, W5 + PH_TAIL)   polyphase input; phase j holds x[., 5v + j]
    w1_ref  : (POOL*PHB, KK)            fused conv1 weight (BN scale folded in);
                                        phase j's (C, K1) block sits at rows
                                        [j*PHB, j*PHB+C), columns [j, j+K1)
    w2_ref  : (K2, C, C)                conv2 weight per tap (BN scale folded in)
    st_ref  : (C, 2)                    folded shifts [t1, t2]
    mask_ref: (1, W5)                   1.0 on valid pooled columns, 0.0 on slack
    o_ref   : (1, C, W5)                output slab (valid columns b*S5 + p, p < Lp)
    pad_ref : (C, W5 + K2 - 1)          scratch: zero-edged padded pooled activations
    """
    # Zero the 15 edge columns every step (cheap; see header note on why this
    # is not hoisted under a first-step pl.when).
    pad_ref[:, :PAD_L] = jnp.zeros((C, PAD_L), pad_ref.dtype)
    pad_ref[:, PAD_L + W5:] = jnp.zeros((C, PAD_R), pad_ref.dtype)

    # ---- conv1 (+BN scale) + shift + ReLU + MaxPool1d(5,5): one fused matmul.
    # X[m, v] = x_padded[5*v + m] for m in [0, KK): four sublane-contiguous
    # shifted copies of the 5 polyphase rows (instead of 5*16 row slices).
    x1 = jnp.concatenate(
        [x_ref[0, :, sh:sh + W5] for sh in range(NSH)], axis=0)          # (KK, W5)
    y1 = jnp.dot(w1_ref[...], x1, preferred_element_type=jnp.float32)    # (120, W5)

    # Phase blocks sit at sublane offsets 0, 24, ..., 96: the pool is four
    # elementwise maxes over aligned 24-row slabs (ReLU/shift commute w/ max).
    p = y1[0:PHB, :]
    for j in range(1, POOL):
        p = jnp.maximum(p, y1[j * PHB:(j + 1) * PHB, :])
    pooled = jnp.maximum(p[:C, :] + st_ref[:, 0:1], 0.0) * mask_ref[...]  # (C, W5)

    # ---- F.pad(_, [8, 7]) via the scratch: a uniform +8 shifted store is
    # exactly per-sample [8 zeros | pooled | 7 zeros] since S5 == Lp + 15 and
    # the slack columns were zeroed by the mask.
    pad_ref[:, PAD_L:PAD_L + W5] = pooled.astype(pad_ref.dtype)

    # ---- conv2 (20 -> 20, k=16) + folded BN: accumulate over the 16 taps
    # straight from the scratch ref (no (320, W5) im2col materialisation).
    acc = jnp.dot(w2_ref[0], pad_ref[:, 0:W5], preferred_element_type=jnp.float32)
    for k in range(1, K2):
        acc = acc + jnp.dot(w2_ref[k], pad_ref[:, k:k + W5],
                            preferred_element_type=jnp.float32)
    o_ref[0] = jnp.maximum(acc + st_ref[:, 1:2], 0.0).astype(o_ref.dtype)


@functools.partial(jax.jit, static_argnames=("block_b", "use_bf16", "out_dtype"))
def se_branch_forward(x, params, *, block_b=128, use_bf16=True,
                      out_dtype=jnp.float32):
    """x: (N, 1, L) float32 -> (N, 20, L // 5) out_dtype."""
    N, _, L = x.shape
    Lp = L // POOL
    S5 = Lp + PAD_L + PAD_R          # per-sample stride of the pooled stage
    S1 = POOL * S5                   # per-sample stride of the conv1 stage

    cdt = jnp.bfloat16 if use_bf16 else jnp.float32
    cdt_bytes = 2 if use_bf16 else 4
    out_bytes = jnp.dtype(out_dtype).itemsize

    B = _pick_block_b(N, S5, block_b, cdt_bytes, out_bytes)
    N_pad = _round_up(N, B)
    NB = N_pad // B
    W5 = B * S5

    # ---- parameter folding (inference-mode BatchNorm + conv bias).  The BN
    # scale is folded into the conv weights so the kernel only adds a shift.
    # TODO(synk): training-mode BatchNorm batch statistics are not modeled.
    s1 = params["g1"] * lax.rsqrt(params["v1"] + BN_EPS)
    t1 = params["beta1"] + (params["b1"] - params["m1"]) * s1
    s2 = params["g2"] * lax.rsqrt(params["v2"] + BN_EPS)
    t2 = params["beta2"] + (params["b2"] - params["m2"]) * s2

    w1s = params["w1"][:, 0, :] * s1[:, None]                       # (C, K1)
    w1big = jnp.zeros((POOL * PHB, KK), jnp.float32)
    for j in range(POOL):
        w1big = w1big.at[j * PHB:j * PHB + C, j:j + K1].set(w1s)
    w1big = w1big.astype(cdt)                                       # (120, 20)

    w2k = jnp.transpose(params["w2"] * s2[:, None, None], (2, 0, 1)).astype(cdt)
    st = jnp.stack([t1, t2], axis=1).astype(jnp.float32)            # (C, 2)

    # Grid-invariant slack mask (valid pooled columns: col % S5 < Lp),
    # fetched once by the constant-index BlockSpec.
    col = jnp.arange(W5, dtype=jnp.int32)
    mask = (col % S5 < Lp).astype(jnp.float32)[None, :]             # (1, W5)

    # ---- layout plumbing: pad + polyphase restride of the input ------------
    # per-sample row: [8 zeros | x | 7 zeros | zeros up to S1]
    xr = jnp.pad(x[:, 0, :], ((0, N_pad - N), (PAD_L, S1 - L - PAD_L)))  # (N_pad, S1)
    xph = xr.reshape(N_pad, S5, POOL).transpose(2, 0, 1)                 # (5, N_pad, S5)
    xph = xph.reshape(POOL, NB, W5).transpose(1, 0, 2)                   # (NB, 5, W5)
    xph = jnp.pad(xph, ((0, 0), (0, 0), (0, PH_TAIL))).astype(cdt)       # (NB, 5, W5+3)

    kernel = functools.partial(se_branch_kernel, W5=W5)
    out = pl.pallas_call(
        kernel,
        out_shape=jax.ShapeDtypeStruct((NB, C, W5), out_dtype),
        grid=(NB,),
        in_specs=[
            pl.BlockSpec((1, POOL, W5 + PH_TAIL), lambda n: (n, 0, 0)),
            pl.BlockSpec((POOL * PHB, KK), lambda n: (0, 0)),
            pl.BlockSpec((K2, C, C), lambda n: (0, 0, 0)),
            pl.BlockSpec((C, 2), lambda n: (0, 0)),
            pl.BlockSpec((1, W5), lambda n: (0, 0)),
        ],
        out_specs=pl.BlockSpec((1, C, W5), lambda n: (n, 0, 0)),
        scratch_shapes=[pltpu.VMEM((C, W5 + K2 - 1), cdt)],
        compiler_params=pltpu.CompilerParams(
            dimension_semantics=("parallel",),
            vmem_limit_bytes=32 * 1024 * 1024),
    )(xph, w1big, w2k, st, mask)

    # ---- layout plumbing (fused under this jit): drop the 15/S5 slack
    # columns per sample and restore (N, C, Lp).
    out = out.reshape(NB, C, B, S5)[:, :, :, :Lp]
    out = out.transpose(0, 2, 1, 3).reshape(N_pad, C, Lp)
    return out[:N]


def se_branch_ref(x, params):
    """Pure-JAX reference (mirrors the PyTorch forward, eval-mode BN)."""
    def bn(z, g, b, m, v):
        return ((z - m[None, :, None]) / jnp.sqrt(v[None, :, None] + BN_EPS)
                * g[None, :, None] + b[None, :, None])

    xp = jnp.pad(x, ((0, 0), (0, 0), (PAD_L, PAD_R)))
    c1 = lax.conv_general_dilated(xp, params["w1"], (1,), "VALID",
                                  dimension_numbers=("NCH", "OIH", "NCH"),
                                  precision=lax.Precision.HIGHEST)
    c1 = c1 + params["b1"][None, :, None]
    y1 = jnp.maximum(bn(c1, params["g1"], params["beta1"],
                        params["m1"], params["v1"]), 0.0)
    pooled = lax.reduce_window(y1, -jnp.inf, lax.max,
                               (1, 1, POOL), (1, 1, POOL), "VALID")
    pp = jnp.pad(pooled, ((0, 0), (0, 0), (PAD_L, PAD_R)))
    c2 = lax.conv_general_dilated(pp, params["w2"], (1,), "VALID",
                                  dimension_numbers=("NCH", "OIH", "NCH"),
                                  precision=lax.Precision.HIGHEST)
    c2 = c2 + params["b2"][None, :, None]
    y2 = jnp.maximum(bn(c2, params["g2"], params["beta2"],
                        params["m2"], params["v2"]), 0.0)
    return y2


if __name__ == "__main__":
    key = jax.random.PRNGKey(0)
    ks = jax.random.split(key, 12)

    params = dict(
        w1=0.10 * jax.random.normal(ks[1], (C, 1, K1), jnp.float32),
        b1=jnp.linspace(-0.1, 0.1, C, dtype=jnp.float32),
        g1=1.0 + 0.05 * jax.random.normal(ks[2], (C,), jnp.float32),
        beta1=0.02 * jax.random.normal(ks[3], (C,), jnp.float32),
        m1=0.01 * jax.random.normal(ks[4], (C,), jnp.float32),
        v1=1.0 + 0.1 * jax.nn.softplus(jax.random.normal(ks[5], (C,), jnp.float32)),
        w2=0.05 * jax.random.normal(ks[6], (C, C, K2), jnp.float32),
        b2=jnp.linspace(-0.05, 0.05, C, dtype=jnp.float32),
        g2=1.0 + 0.05 * jax.random.normal(ks[7], (C,), jnp.float32),
        beta2=0.02 * jax.random.normal(ks[8], (C,), jnp.float32),
        m2=0.01 * jax.random.normal(ks[9], (C,), jnp.float32),
        v2=1.0 + 0.1 * jax.nn.softplus(jax.random.normal(ks[10], (C,), jnp.float32)),
    )

    # --- test 1: bands divisible by the pool, multi-step grid, f32 & bf16 ---
    N, bands = 10, 40
    x = jax.random.normal(ks[0], (N, 1, bands), jnp.float32)
    ref = jax.block_until_ready(se_branch_ref(x, params))

    out32 = jax.block_until_ready(
        se_branch_forward(x, params, block_b=8, use_bf16=False))
    assert out32.shape == (N, C, bands // POOL), out32.shape
    assert jnp.allclose(out32, ref, atol=2e-3, rtol=2e-3), float(
        jnp.max(jnp.abs(out32 - ref)))

    outbf = jax.block_until_ready(
        se_branch_forward(x, params, block_b=8, use_bf16=True))
    assert jnp.allclose(outbf, ref, atol=2e-2, rtol=2e-2), float(
        jnp.max(jnp.abs(outbf - ref)))

    # --- test 2: bands not divisible by the pool (floor semantics) ----------
    N2, bands2 = 3, 43
    x2 = jax.random.normal(ks[11], (N2, 1, bands2), jnp.float32)
    ref2 = jax.block_until_ready(se_branch_ref(x2, params))
    out2 = jax.block_until_ready(se_branch_forward(x2, params))
    assert out2.shape == (N2, C, bands2 // POOL), out2.shape
    assert jnp.allclose(out2, ref2, atol=2e-2, rtol=2e-2), float(
        jnp.max(jnp.abs(out2 - ref2)))

    print("KERNEL_OK")
</pallas_src>

<mosaic_0001>
module attributes {stable_mosaic.version = 11 : i64} {
  func.func @se_branch_kernel(%arg0: i32, %arg1: memref<1x5x187xf32, #tpu.memory_space<vmem>>, %arg2: memref<120x20xf32, #tpu.memory_space<vmem>>, %arg3: memref<16x20x20xf32, #tpu.memory_space<vmem>>, %arg4: memref<20x2xf32, #tpu.memory_space<vmem>>, %arg5: memref<1x184xf32, #tpu.memory_space<vmem>>, %arg6: memref<1x20x184xf32, #tpu.memory_space<vmem>>, %arg7: memref<20x199xf32, #tpu.memory_space<vmem>>) attributes {dimension_semantics = [#tpu.dimension_semantics<parallel>], iteration_bounds = array<i64: 2>, scalar_prefetch = 0 : i64, scratch_operands = 1 : i64, tpu.core_type = #tpu.core_type<tc>, window_params = [{transform_indices = @transform_0, window_bounds = array<i64: 1, 5, 187>}, {pipeline_mode = #tpu.pipeline_mode<synchronous>, transform_indices = @transform_1, window_bounds = array<i64: 120, 20>}, {pipeline_mode = #tpu.pipeline_mode<synchronous>, transform_indices = @transform_2, window_bounds = array<i64: 16, 20, 20>}, {pipeline_mode = #tpu.pipeline_mode<synchronous>, transform_indices = @transform_3, window_bounds = array<i64: 20, 2>}, {pipeline_mode = #tpu.pipeline_mode<synchronous>, transform_indices = @transform_4, window_bounds = array<i64: 1, 184>}, {transform_indices = @transform_5, window_bounds = array<i64: 1, 20, 184>}]} {
    %cst = arith.constant 0.000000e+00 : f32
    %0 = vector.broadcast %cst : f32 to vector<20x8xf32>
    %c0 = arith.constant 0 : index
    %c0_0 = arith.constant 0 : index
    %1 = vector.load %arg7[%c0, %c0_0] : memref<20x199xf32, #tpu.memory_space<vmem>>, vector<20x8xf32>
    tpu.vector_store %arg7[%c0, %c0_0], %0 {strides = array<i32>} : memref<20x199xf32, #tpu.memory_space<vmem>>, vector<20x8xf32>,
    %cst_1 = arith.constant 0.000000e+00 : f32
    %2 = vector.broadcast %cst_1 : f32 to vector<20x7xf32>
    %c0_2 = arith.constant 0 : index
    %c192 = arith.constant 192 : index
    %3 = vector.load %arg7[%c0_2, %c192] : memref<20x199xf32, #tpu.memory_space<vmem>>, vector<20x7xf32>
    tpu.vector_store %arg7[%c0_2, %c192], %2 {strides = array<i32>} : memref<20x199xf32, #tpu.memory_space<vmem>>, vector<20x7xf32>,
    %c0_3 = arith.constant 0 : index
    %c0_4 = arith.constant 0 : index
    %c0_5 = arith.constant 0 : index
    %4 = vector.load %arg1[%c0_3, %c0_4, %c0_5] : memref<1x5x187xf32, #tpu.memory_space<vmem>>, vector<1x5x184xf32>
    %5 = vector.shape_cast %4 : vector<1x5x184xf32> to vector<5x184xf32>
    %c0_6 = arith.constant 0 : index
    %c0_7 = arith.constant 0 : index
    %c1 = arith.constant 1 : index
    %6 = vector.load %arg1[%c0_6, %c0_7, %c1] : memref<1x5x187xf32, #tpu.memory_space<vmem>>, vector<1x5x184xf32>
    %7 = vector.shape_cast %6 : vector<1x5x184xf32> to vector<5x184xf32>
    %c0_8 = arith.constant 0 : index
    %c0_9 = arith.constant 0 : index
    %c2 = arith.constant 2 : index
    %8 = vector.load %arg1[%c0_8, %c0_9, %c2] : memref<1x5x187xf32, #tpu.memory_space<vmem>>, vector<1x5x184xf32>
    %9 = vector.shape_cast %8 : vector<1x5x184xf32> to vector<5x184xf32>
    %c0_10 = arith.constant 0 : index
    %c0_11 = arith.constant 0 : index
    %c3 = arith.constant 3 : index
    %10 = vector.load %arg1[%c0_10, %c0_11, %c3] : memref<1x5x187xf32, #tpu.memory_space<vmem>>, vector<1x5x184xf32>
    %11 = vector.shape_cast %10 : vector<1x5x184xf32> to vector<5x184xf32>
    %12 = tpu.concatenate %5, %7, %9, %11 in 0 : vector<5x184xf32>, vector<5x184xf32>, vector<5x184xf32>, vector<5x184xf32> -> vector<20x184xf32>
    %c0_12 = arith.constant 0 : index
    %c0_13 = arith.constant 0 : index
    %13 = vector.load %arg2[%c0_12, %c0_13] : memref<120x20xf32, #tpu.memory_space<vmem>>, vector<120x20xf32>
    %cst_14 = arith.constant dense<0.000000e+00> : vector<120x184xf32>
    %14 = tpu.matmul %13, %12, %cst_14 {dimension_numbers = #tpu.dot_dimension_numbers<[1], [0], [0], [1], [0, 0, 1, 1], [], []>} : vector<120x20xf32>, vector<20x184xf32>, vector<120x184xf32> -> vector<120x184xf32>
    %15 = vector.extract_strided_slice %14 {offsets = [0, 0], sizes = [24, 184], strides = [1, 1]} : vector<120x184xf32> to vector<24x184xf32>
    %16 = vector.extract_strided_slice %14 {offsets = [24, 0], sizes = [24, 184], strides = [1, 1]} : vector<120x184xf32> to vector<24x184xf32>
    %17 = arith.maximumf %15, %16 : vector<24x184xf32>
    %18 = vector.extract_strided_slice %14 {offsets = [48, 0], sizes = [24, 184], strides = [1, 1]} : vector<120x184xf32> to vector<24x184xf32>
    %19 = arith.maximumf %17, %18 : vector<24x184xf32>
    %20 = vector.extract_strided_slice %14 {offsets = [72, 0], sizes = [24, 184], strides = [1, 1]} : vector<120x184xf32> to vector<24x184xf32>
    %21 = arith.maximumf %19, %20 : vector<24x184xf32>
    %22 = vector.extract_strided_slice %14 {offsets = [96, 0], sizes = [24, 184], strides = [1, 1]} : vector<120x184xf32> to vector<24x184xf32>
    %23 = arith.maximumf %21, %22 : vector<24x184xf32>
    %24 = vector.extract_strided_slice %23 {offsets = [0, 0], sizes = [20, 184], strides = [1, 1]} : vector<24x184xf32> to vector<20x184xf32>
    %c0_15 = arith.constant 0 : index
    %c0_16 = arith.constant 0 : index
    %25 = vector.load %arg4[%c0_15, %c0_16] : memref<20x2xf32, #tpu.memory_space<vmem>>, vector<20x1xf32>
    %26 = vector.broadcast %25 : vector<20x1xf32> to vector<20x184xf32>
    %27 = arith.addf %24, %26 : vector<20x184xf32>
    %cst_17 = arith.constant 0.000000e+00 : f32
    %28 = vector.broadcast %cst_17 : f32 to vector<20x184xf32>
    %29 = arith.maximumf %27, %28 : vector<20x184xf32>
    %c0_18 = arith.constant 0 : index
    %c0_19 = arith.constant 0 : index
    %30 = vector.load %arg5[%c0_18, %c0_19] : memref<1x184xf32, #tpu.memory_space<vmem>>, vector<1x184xf32>
    %31 = vector.broadcast %30 : vector<1x184xf32> to vector<20x184xf32>
    %32 = arith.mulf %29, %31 : vector<20x184xf32>
    %c0_20 = arith.constant 0 : index
    %c8 = arith.constant 8 : index
    %33 = vector.load %arg7[%c0_20, %c8] : memref<20x199xf32, #tpu.memory_space<vmem>>, vector<20x184xf32>
    tpu.vector_store %arg7[%c0_20, %c8], %32 {strides = array<i32>} : memref<20x199xf32, #tpu.memory_space<vmem>>, vector<20x184xf32>,
    %c0_21 = arith.constant 0 : index
    %c0_22 = arith.constant 0 : index
    %c0_23 = arith.constant 0 : index
    %34 = vector.load %arg3[%c0_21, %c0_22, %c0_23] : memref<16x20x20xf32, #tpu.memory_space<vmem>>, vector<1x20x20xf32>
    %35 = vector.shape_cast %34 : vector<1x20x20xf32> to vector<20x20xf32>
    %c0_24 = arith.constant 0 : index
    %c0_25 = arith.constant 0 : index
    %36 = vector.load %arg7[%c0_24, %c0_25] : memref<20x199xf32, #tpu.memory_space<vmem>>, vector<20x184xf32>
    %cst_26 = arith.constant dense<0.000000e+00> : vector<20x184xf32>
    %37 = tpu.matmul %35, %36, %cst_26 {dimension_numbers = #tpu.dot_dimension_numbers<[1], [0], [0], [1], [0, 0, 1, 1], [], []>} : vector<20x20xf32>, vector<20x184xf32>, vector<20x184xf32> -> vector<20x184xf32>
    %c1_27 = arith.constant 1 : index
    %c0_28 = arith.constant 0 : index
    %c0_29 = arith.constant 0 : index
    %38 = vector.load %arg3[%c1_27, %c0_28, %c0_29] : memref<16x20x20xf32, #tpu.memory_space<vmem>>, vector<1x20x20xf32>
    %39 = vector.shape_cast %38 : vector<1x20x20xf32> to vector<20x20xf32>
    %c0_30 = arith.constant 0 : index
    %c1_31 = arith.constant 1 : index
    %40 = vector.load %arg7[%c0_30, %c1_31] : memref<20x199xf32, #tpu.memory_space<vmem>>, vector<20x184xf32>
    %cst_32 = arith.constant dense<0.000000e+00> : vector<20x184xf32>
    %41 = tpu.matmul %39, %40, %cst_32 {dimension_numbers = #tpu.dot_dimension_numbers<[1], [0], [0], [1], [0, 0, 1, 1], [], []>} : vector<20x20xf32>, vector<20x184xf32>, vector<20x184xf32> -> vector<20x184xf32>
    %42 = arith.addf %37, %41 : vector<20x184xf32>
    %c2_33 = arith.constant 2 : index
    %c0_34 = arith.constant 0 : index
    %c0_35 = arith.constant 0 : index
    %43 = vector.load %arg3[%c2_33, %c0_34, %c0_35] : memref<16x20x20xf32, #tpu.memory_space<vmem>>, vector<1x20x20xf32>
    %44 = vector.shape_cast %43 : vector<1x20x20xf32> to vector<20x20xf32>
    %c0_36 = arith.constant 0 : index
    %c2_37 = arith.constant 2 : index
    %45 = vector.load %arg7[%c0_36, %c2_37] : memref<20x199xf32, #tpu.memory_space<vmem>>, vector<20x184xf32>
    %cst_38 = arith.constant dense<0.000000e+00> : vector<20x184xf32>
    %46 = tpu.matmul %44, %45, %cst_38 {dimension_numbers = #tpu.dot_dimension_numbers<[1], [0], [0], [1], [0, 0, 1, 1], [], []>} : vector<20x20xf32>, vector<20x184xf32>, vector<20x184xf32> -> vector<20x184xf32>
    %47 = arith.addf %42, %46 : vector<20x184xf32>
    %c3_39 = arith.constant 3 : index
    %c0_40 = arith.constant 0 : index
    %c0_41 = arith.constant 0 : index
    %48 = vector.load %arg3[%c3_39, %c0_40, %c0_41] : memref<16x20x20xf32, #tpu.memory_space<vmem>>, vector<1x20x20xf32>
    %49 = vector.shape_cast %48 : vector<1x20x20xf32> to vector<20x20xf32>
    %c0_42 = arith.constant 0 : index
    %c3_43 = arith.constant 3 : index
    %50 = vector.load %arg7[%c0_42, %c3_43] : memref<20x199xf32, #tpu.memory_space<vmem>>, vector<20x184xf32>
    %cst_44 = arith.constant dense<0.000000e+00> : vector<20x184xf32>
    %51 = tpu.matmul %49, %50, %cst_44 {dimension_numbers = #tpu.dot_dimension_numbers<[1], [0], [0], [1], [0, 0, 1, 1], [], []>} : vector<20x20xf32>, vector<20x184xf32>, vector<20x184xf32> -> vector<20x184xf32>
    %52 = arith.addf %47, %51 : vector<20x184xf32>
    %c4 = arith.constant 4 : index
    %c0_45 = arith.constant 0 : index
    %c0_46 = arith.constant 0 : index
    %53 = vector.load %arg3[%c4, %c0_45, %c0_46] : memref<16x20x20xf32, #tpu.memory_space<vmem>>, vector<1x20x20xf32>
    %54 = vector.shape_cast %53 : vector<1x20x20xf32> to vector<20x20xf32>
    %c0_47 = arith.constant 0 : index
    %c4_48 = arith.constant 4 : index
    %55 = vector.load %arg7[%c0_47, %c4_48] : memref<20x199xf32, #tpu.memory_space<vmem>>, vector<20x184xf32>
    %cst_49 = arith.constant dense<0.000000e+00> : vector<20x184xf32>
    %56 = tpu.matmul %54, %55, %cst_49 {dimension_numbers = #tpu.dot_dimension_numbers<[1], [0], [0], [1], [0, 0, 1, 1], [], []>} : vector<20x20xf32>, vector<20x184xf32>, vector<20x184xf32> -> vector<20x184xf32>
    %57 = arith.addf %52, %56 : vector<20x184xf32>
    %c5 = arith.constant 5 : index
    %c0_50 = arith.constant 0 : index
    %c0_51 = arith.constant 0 : index
    %58 = vector.load %arg3[%c5, %c0_50, %c0_51] : memref<16x20x20xf32, #tpu.memory_space<vmem>>, vector<1x20x20xf32>
    %59 = vector.shape_cast %58 : vector<1x20x20xf32> to vector<20x20xf32>
    %c0_52 = arith.constant 0 : index
    %c5_53 = arith.constant 5 : index
    %60 = vector.load %arg7[%c0_52, %c5_53] : memref<20x199xf32, #tpu.memory_space<vmem>>, vector<20x184xf32>
    %cst_54 = arith.constant dense<0.000000e+00> : vector<20x184xf32>
    %61 = tpu.matmul %59, %60, %cst_54 {dimension_numbers = #tpu.dot_dimension_numbers<[1], [0], [0], [1], [0, 0, 1, 1], [], []>} : vector<20x20xf32>, vector<20x184xf32>, vector<20x184xf32> -> vector<20x184xf32>
    %62 = arith.addf %57, %61 : vector<20x184xf32>
    %c6 = arith.constant 6 : index
    %c0_55 = arith.constant 0 : index
    %c0_56 = arith.constant 0 : index
    %63 = vector.load %arg3[%c6, %c0_55, %c0_56] : memref<16x20x20xf32, #tpu.memory_space<vmem>>, vector<1x20x20xf32>
    %64 = vector.shape_cast %63 : vector<1x20x20xf32> to vector<20x20xf32>
    %c0_57 = arith.constant 0 : index
    %c6_58 = arith.constant 6 : index
    %65 = vector.load %arg7[%c0_57, %c6_58] : memref<20x199xf32, #tpu.memory_space<vmem>>, vector<20x184xf32>
    %cst_59 = arith.constant dense<0.000000e+00> : vector<20x184xf32>
    %66 = tpu.matmul %64, %65, %cst_59 {dimension_numbers = #tpu.dot_dimension_numbers<[1], [0], [0], [1], [0, 0, 1, 1], [], []>} : vector<20x20xf32>, vector<20x184xf32>, vector<20x184xf32> -> vector<20x184xf32>
    %67 = arith.addf %62, %66 : vector<20x184xf32>
    %c7 = arith.constant 7 : index
    %c0_60 = arith.constant 0 : index
    %c0_61 = arith.constant 0 : index
    %68 = vector.load %arg3[%c7, %c0_60, %c0_61] : memref<16x20x20xf32, #tpu.memory_space<vmem>>, vector<1x20x20xf32>
    %69 = vector.shape_cast %68 : vector<1x20x20xf32> to vector<20x20xf32>
    %c0_62 = arith.constant 0 : index
    %c7_63 = arith.constant 7 : index
    %70 = vector.load %arg7[%c0_62, %c7_63] : memref<20x199xf32, #tpu.memory_space<vmem>>, vector<20x184xf32>
    %cst_64 = arith.constant dense<0.000000e+00> : vector<20x184xf32>
    %71 = tpu.matmul %69, %70, %cst_64 {dimension_numbers = #tpu.dot_dimension_numbers<[1], [0], [0], [1], [0, 0, 1, 1], [], []>} : vector<20x20xf32>, vector<20x184xf32>, vector<20x184xf32> -> vector<20x184xf32>
    %72 = arith.addf %67, %71 : vector<20x184xf32>
    %c8_65 = arith.constant 8 : index
    %c0_66 = arith.constant 0 : index
    %c0_67 = arith.constant 0 : index
    %73 = vector.load %arg3[%c8_65, %c0_66, %c0_67] : memref<16x20x20xf32, #tpu.memory_space<vmem>>, vector<1x20x20xf32>
    %74 = vector.shape_cast %73 : vector<1x20x20xf32> to vector<20x20xf32>
    %c0_68 = arith.constant 0 : index
    %c8_69 = arith.constant 8 : index
    %75 = vector.load %arg7[%c0_68, %c8_69] : memref<20x199xf32, #tpu.memory_space<vmem>>, vector<20x184xf32>
    %cst_70 = arith.constant dense<0.000000e+00> : vector<20x184xf32>
    %76 = tpu.matmul %74, %75, %cst_70 {dimension_numbers = #tpu.dot_dimension_numbers<[1], [0], [0], [1], [0, 0, 1, 1], [], []>} : vector<20x20xf32>, vector<20x184xf32>, vector<20x184xf32> -> vector<20x184xf32>
    %77 = arith.addf %72, %76 : vector<20x184xf32>
    %c9 = arith.constant 9 : index
    %c0_71 = arith.constant 0 : index
    %c0_72 = arith.constant 0 : index
    %78 = vector.load %arg3[%c9, %c0_71, %c0_72] : memref<16x20x20xf32, #tpu.memory_space<vmem>>, vector<1x20x20xf32>
    %79 = vector.shape_cast %78 : vector<1x20x20xf32> to vector<20x20xf32>
    %c0_73 = arith.constant 0 : index
    %c9_74 = arith.constant 9 : index
    %80 = vector.load %arg7[%c0_73, %c9_74] : memref<20x199xf32, #tpu.memory_space<vmem>>, vector<20x184xf32>
    %cst_75 = arith.constant dense<0.000000e+00> : vector<20x184xf32>
    %81 = tpu.matmul %79, %80, %cst_75 {dimension_numbers = #tpu.dot_dimension_numbers<[1], [0], [0], [1], [0, 0, 1, 1], [], []>} : vector<20x20xf32>, vector<20x184xf32>, vector<20x184xf32> -> vector<20x184xf32>
    %82 = arith.addf %77, %81 : vector<20x184xf32>
    %c10 = arith.constant 10 : index
    %c0_76 = arith.constant 0 : index
    %c0_77 = arith.constant 0 : index
    %83 = vector.load %arg3[%c10, %c0_76, %c0_77] : memref<16x20x20xf32, #tpu.memory_space<vmem>>, vector<1x20x20xf32>
    %84 = vector.shape_cast %83 : vector<1x20x20xf32> to vector<20x20xf32>
    %c0_78 = arith.constant 0 : index
    %c10_79 = arith.constant 10 : index
    %85 = vector.load %arg7[%c0_78, %c10_79] : memref<20x199xf32, #tpu.memory_space<vmem>>, vector<20x184xf32>
    %cst_80 = arith.constant dense<0.000000e+00> : vector<20x184xf32>
    %86 = tpu.matmul %84, %85, %cst_80 {dimension_numbers = #tpu.dot_dimension_numbers<[1], [0], [0], [1], [0, 0, 1, 1], [], []>} : vector<20x20xf32>, vector<20x184xf32>, vector<20x184xf32> -> vector<20x184xf32>
    %87 = arith.addf %82, %86 : vector<20x184xf32>
    %c11 = arith.constant 11 : index
    %c0_81 = arith.constant 0 : index
    %c0_82 = arith.constant 0 : index
    %88 = vector.load %arg3[%c11, %c0_81, %c0_82] : memref<16x20x20xf32, #tpu.memory_space<vmem>>, vector<1x20x20xf32>
    %89 = vector.shape_cast %88 : vector<1x20x20xf32> to vector<20x20xf32>
    %c0_83 = arith.constant 0 : index
    %c11_84 = arith.constant 11 : index
    %90 = vector.load %arg7[%c0_83, %c11_84] : memref<20x199xf32, #tpu.memory_space<vmem>>, vector<20x184xf32>
    %cst_85 = arith.constant dense<0.000000e+00> : vector<20x184xf32>
    %91 = tpu.matmul %89, %90, %cst_85 {dimension_numbers = #tpu.dot_dimension_numbers<[1], [0], [0], [1], [0, 0, 1, 1], [], []>} : vector<20x20xf32>, vector<20x184xf32>, vector<20x184xf32> -> vector<20x184xf32>
    %92 = arith.addf %87, %91 : vector<20x184xf32>
    %c12 = arith.constant 12 : index
    %c0_86 = arith.constant 0 : index
    %c0_87 = arith.constant 0 : index
    %93 = vector.load %arg3[%c12, %c0_86, %c0_87] : memref<16x20x20xf32, #tpu.memory_space<vmem>>, vector<1x20x20xf32>
    %94 = vector.shape_cast %93 : vector<1x20x20xf32> to vector<20x20xf32>
    %c0_88 = arith.constant 0 : index
    %c12_89 = arith.constant 12 : index
    %95 = vector.load %arg7[%c0_88, %c12_89] : memref<20x199xf32, #tpu.memory_space<vmem>>, vector<20x184xf32>
    %cst_90 = arith.constant dense<0.000000e+00> : vector<20x184xf32>
    %96 = tpu.matmul %94, %95, %cst_90 {dimension_numbers = #tpu.dot_dimension_numbers<[1], [0], [0], [1], [0, 0, 1, 1], [], []>} : vector<20x20xf32>, vector<20x184xf32>, vector<20x184xf32> -> vector<20x184xf32>
    %97 = arith.addf %92, %96 : vector<20x184xf32>
    %c13 = arith.constant 13 : index
    %c0_91 = arith.constant 0 : index
    %c0_92 = arith.constant 0 : index
    %98 = vector.load %arg3[%c13, %c0_91, %c0_92] : memref<16x20x20xf32, #tpu.memory_space<vmem>>, vector<1x20x20xf32>
    %99 = vector.shape_cast %98 : vector<1x20x20xf32> to vector<20x20xf32>
    %c0_93 = arith.constant 0 : index
    %c13_94 = arith.constant 13 : index
    %100 = vector.load %arg7[%c0_93, %c13_94] : memref<20x199xf32, #tpu.memory_space<vmem>>, vector<20x184xf32>
    %cst_95 = arith.constant dense<0.000000e+00> : vector<20x184xf32>
    %101 = tpu.matmul %99, %100, %cst_95 {dimension_numbers = #tpu.dot_dimension_numbers<[1], [0], [0], [1], [0, 0, 1, 1], [], []>} : vector<20x20xf32>, vector<20x184xf32>, vector<20x184xf32> -> vector<20x184xf32>
    %102 = arith.addf %97, %101 : vector<20x184xf32>
    %c14 = arith.constant 14 : index
    %c0_96 = arith.constant 0 : index
    %c0_97 = arith.constant 0 : index
    %103 = vector.load %arg3[%c14, %c0_96, %c0_97] : memref<16x20x20xf32, #tpu.memory_space<vmem>>, vector<1x20x20xf32>
    %104 = vector.shape_cast %103 : vector<1x20x20xf32> to vector<20x20xf32>
    %c0_98 = arith.constant 0 : index
    %c14_99 = arith.constant 14 : index
    %105 = vector.load %arg7[%c0_98, %c14_99] : memref<20x199xf32, #tpu.memory_space<vmem>>, vector<20x184xf32>
    %cst_100 = arith.constant dense<0.000000e+00> : vector<20x184xf32>
    %106 = tpu.matmul %104, %105, %cst_100 {dimension_numbers = #tpu.dot_dimension_numbers<[1], [0], [0], [1], [0, 0, 1, 1], [], []>} : vector<20x20xf32>, vector<20x184xf32>, vector<20x184xf32> -> vector<20x184xf32>
    %107 = arith.addf %102, %106 : vector<20x184xf32>
    %c15 = arith.constant 15 : index
    %c0_101 = arith.constant 0 : index
    %c0_102 = arith.constant 0 : index
    %108 = vector.load %arg3[%c15, %c0_101, %c0_102] : memref<16x20x20xf32, #tpu.memory_space<vmem>>, vector<1x20x20xf32>
    %109 = vector.shape_cast %108 : vector<1x20x20xf32> to vector<20x20xf32>
    %c0_103 = arith.constant 0 : index
    %c15_104 = arith.constant 15 : index
    %110 = vector.load %arg7[%c0_103, %c15_104] : memref<20x199xf32, #tpu.memory_space<vmem>>, vector<20x184xf32>
    %cst_105 = arith.constant dense<0.000000e+00> : vector<20x184xf32>
    %111 = tpu.matmul %109, %110, %cst_105 {dimension_numbers = #tpu.dot_dimension_numbers<[1], [0], [0], [1], [0, 0, 1, 1], [], []>} : vector<20x20xf32>, vector<20x184xf32>, vector<20x184xf32> -> vector<20x184xf32>
    %112 = arith.addf %107, %111 : vector<20x184xf32>
    %c0_106 = arith.constant 0 : index
    %c1_107 = arith.constant 1 : index
    %113 = vector.load %arg4[%c0_106, %c1_107] : memref<20x2xf32, #tpu.memory_space<vmem>>, vector<20x1xf32>
    %114 = vector.broadcast %113 : vector<20x1xf32> to vector<20x184xf32>
    %115 = arith.addf %112, %114 : vector<20x184xf32>
    %cst_108 = arith.constant 0.000000e+00 : f32
    %116 = vector.broadcast %cst_108 : f32 to vector<20x184xf32>
    %117 = arith.maximumf %115, %116 : vector<20x184xf32>
    %c0_109 = arith.constant 0 : index
    %c0_110 = arith.constant 0 : index
    %c0_111 = arith.constant 0 : index
    %118 = vector.load %arg6[%c0_109, %c0_110, %c0_111] : memref<1x20x184xf32, #tpu.memory_space<vmem>>, vector<1x20x184xf32>
    %119 = vector.shape_cast %118 : vector<1x20x184xf32> to vector<20x184xf32>
    %120 = vector.shape_cast %117 : vector<20x184xf32> to vector<1x20x184xf32>
    tpu.vector_store %arg6[%c0_109, %c0_110, %c0_111], %120 {strides = array<i32>} : memref<1x20x184xf32, #tpu.memory_space<vmem>>, vector<1x20x184xf32>,
    return
  }
  func.func @transform_0(%arg0: i32) -> (i32, i32, i32) {
    %c0_i32 = arith.constant 0 : i32
    %c0_i32_0 = arith.constant 0 : i32
    %c0_i32_1 = arith.constant 0 : i32
    return %arg0, %c0_i32, %c0_i32_0 : i32, i32, i32
  }
  func.func @transform_1(%arg0: i32) -> (i32, i32) {
    %c0_i32 = arith.constant 0 : i32
    %c0_i32_0 = arith.constant 0 : i32
    %c0_i32_1 = arith.constant 0 : i32
    return %c0_i32, %c0_i32_0 : i32, i32
  }
  func.func @transform_2(%arg0: i32) -> (i32, i32, i32) {
    %c0_i32 = arith.constant 0 : i32
    %c0_i32_0 = arith.constant 0 : i32
    %c0_i32_1 = arith.constant 0 : i32
    %c0_i32_2 = arith.constant 0 : i32
    return %c0_i32, %c0_i32_0, %c0_i32_1 : i32, i32, i32
  }
  func.func @transform_3(%arg0: i32) -> (i32, i32) {
    %c0_i32 = arith.constant 0 : i32
    %c0_i32_0 = arith.constant 0 : i32
    %c0_i32_1 = arith.constant 0 : i32
    return %c0_i32, %c0_i32_0 : i32, i32
  }
  func.func @transform_4(%arg0: i32) -> (i32, i32) {
    %c0_i32 = arith.constant 0 : i32
    %c0_i32_0 = arith.constant 0 : i32
    %c0_i32_1 = arith.constant 0 : i32
    return %c0_i32, %c0_i32_0 : i32, i32
  }
  func.func @transform_5(%arg0: i32) -> (i32, i32, i32) {
    %c0_i32 = arith.constant 0 : i32
    %c0_i32_0 = arith.constant 0 : i32
    %c0_i32_1 = arith.constant 0 : i32
    return %arg0, %c0_i32, %c0_i32_0 : i32, i32, i32
  }
}

</mosaic_0001>

<bundles_post_ra>
// kernel: se_branch_forward.1
= control target key start
LH: loop header
LB: loop body
LE: loop exit
PB: predicated region body
PF: predicated region fallthrough
CT: control target
= control target key end

     0   :  { %s3257_s18 = smov 0   ;;  %s3859_s0 = inlined_call_operand.vmem [shape: f32[2,5,187], index: 0, kind: input, shape index: {}]   ;;  %s3860_s1 = inlined_call_operand.vmem [shape: f32[120,20], index: 1, kind: input, shape index: {}]   ;;  %s3861_s2 = inlined_call_operand.vmem [shape: f32[16,20,20], index: 2, kind: input, shape index: {}]   ;;  %s3862_s3 = inlined_call_operand.vmem [shape: f32[20,2], index: 3, kind: input, shape index: {}]   ;;  %s3863_s4 = inlined_call_operand.vmem [shape: f32[1,184], index: 4, kind: input, shape index: {}]   ;;  %s3864_s5 = inlined_call_operand.vmem [shape: f32[2,20,184], index: 5, kind: output, shape index: {}]  }
   0x1 LB: > { %s2693_s19 = sadd.s32 4294967295, %s3206_s18   ;;  %p2697_p0 = scmp.ge.s32.totalorder %s3206_s18, 1  ;;  %s3206_s18 = sphi %s3257_s18, %s15_s18  }
   0x2   : > { %p187_p1 = scmp.lt.s32.totalorder %s3206_s18, 3 }
   0x4   : > { %p188_p2 = pnand %p2697_p0, %p187_p1 }
   0x5   : > { %p215_p3 = scmp.lt.s32.totalorder (!%p188_p2), %s2693_s19, 1  ;;  %s3208_s24 = smov (!%p188_p2), 125   ;;  %v3210_v10 = vmov (!%p188_p2), 0.0   ;;  %v524_v11 = vld [vmem:[%s3862_s3 + $0x8] sm:$0xff] (!%p188_p2)  ;;  %v523_v12 = vld [vmem:[%s3862_s3] sm:$0xff] (!%p188_p2)  ;;  %v3212_v13 = vmov (!%p188_p2), 0  }
   0x6   : > { %191 = sbr.rel (%p188_p2) target bundleno = 1021 (0x3fd), region = 40  ;;  %s3209_s25 = smov (!%p188_p2), 127   ;;  %408 = vmatprep.mubr.f32.mxu0 (!%p188_p2), %v3210_v10  ;;  %1321 = vmatprep.mubr.f32.mxu1 (!%p188_p2), %v3210_v10  ;;  %v525_v14 = vld [vmem:[%s3862_s3 + $0x10] sm:$0xf] (!%p188_p2)  ;;  %vm245_vm0 = vcmask (!%p188_p2), 1039360   ;;  %vm265_vm1 = vcmask (!%p188_p2), 1022976  }
   0x7   : > { %s3211_s26 = smov (!%p188_p2), 126   ;;  %3047 = vset.pattern.permute.xlu1 (!%p188_p2), %v3212_v13  ;;  %3046 = vset.pattern.permute.xlu0 (!%p188_p2), %v3212_v13  ;;  %vm255_vm2 = vcmask (!%p188_p2), 1031168   ;;  %vm272_vm3 = vcmask (!%p188_p2), 1041408   ;;  %vm269_vm4 = vcmask (!%p188_p2), 1044480   ;;  %vm275_vm5 = vcmask (!%p188_p2), 1046528   ;;  %v278_v34 = vld [vmem:[%s3860_s1] sm:$0xff] (!%p188_p2) }
   0x8   : > { %vm339_vm6 = vcmask (!%p188_p2), 1043456   ;;  %vm293_vm7 = vcmask (!%p188_p2), 162816   ;;  %v279_v35 = vld [vmem:[%s3860_s1 + $0x8] sm:$0xff] (!%p188_p2)  ;;  %v280_v36 = vld [vmem:[%s3860_s1 + $0x10] sm:$0xff] (!%p188_p2)  ;;  %v281_v37 = vld [vmem:[%s3860_s1 + $0x18] sm:$0xff] (!%p188_p2)  ;;  %vm225_vm8 = vcmask (!%p188_p2), 64512  }
   0x9   : > { %v282_v38 = vld [vmem:[%s3860_s1 + $0x20] sm:$0xff] (!%p188_p2)  ;;  %v283_v39 = vld [vmem:[%s3860_s1 + $0x28] sm:$0xff] (!%p188_p2)  ;;  %v284_v40 = vld [vmem:[%s3860_s1 + $0x30] sm:$0xff] (!%p188_p2)  ;;  %226 = vst.msk [vmem:[#allocation2] sm:$0xff] (!%p188_p2), %vm225_vm8, %v3210_v10  ;;  %vm230_vm9 = vcmask (!%p188_p2), 581120   ;;  %vm228_vm10 = vcmask (!%p188_p2), 60416  }
   0xa   : > { %v285_v41 = vld [vmem:[%s3860_s1 + $0x38] sm:$0xff] (!%p188_p2)  ;;  %v286_v42 = vld [vmem:[%s3860_s1 + $0x40] sm:$0xff] (!%p188_p2)  ;;  %v287_v43 = vld [vmem:[%s3860_s1 + $0x48] sm:$0xff] (!%p188_p2)  ;;  %227 = vst.msk [vmem:[#allocation2 + $0x10] sm:$0xff] (!%p188_p2), %vm225_vm8, %v3210_v10  ;;  %vm233_vm11 = vcmask (!%p188_p2), 577024   ;;  %s3213_s22 = smov (!%p188_p2), 8  }
   0xb   : > { %v288_v44 = vld [vmem:[%s3860_s1 + $0x50] sm:$0xff] (!%p188_p2)  ;;  %v289_v45 = vld [vmem:[%s3860_s1 + $0x58] sm:$0xff] (!%p188_p2)  ;;  %v290_v46 = vld [vmem:[%s3860_s1 + $0x60] sm:$0xff] (!%p188_p2)  ;;  %231 = vst.msk [vmem:[#allocation2 + $0x8] sm:$0xff] (!%p188_p2), %vm230_vm9, %v3210_v10  ;;  %vm598_vm12 = vcmask (!%p188_p2), 1047616   ;;  %vm600_vm13 = vcmask (!%p188_p2), 523264  }
   0xc   : > { %v291_v47 = vld [vmem:[%s3860_s1 + $0x68] sm:$0xff] (!%p188_p2)  ;;  %v292_v48 = vld [vmem:[%s3860_s1 + $0x70] sm:$0xff] (!%p188_p2)  ;;  %232 = vst.msk [vmem:[#allocation2 + $0x18] sm:$0xff] (!%p188_p2), %vm230_vm9, %v3210_v10  ;;  %vm604_vm14 = vcmask (!%p188_p2), 1043520   ;;  %vm606_vm15 = vcmask (!%p188_p2), 519168   ;;  %s3215_s27 = smov (!%p188_p2), 122  }
   0xd   : > { %s3866_s19 = smov (!%p215_p3, %s2693_s19), 1  ;;  %229 = vst.msk [vmem:[#allocation2 + $0x20] sm:$0xf] %vm228_vm10, %v3210_v10  ;;  %s3216_s28 = smov 121   ;;  %vm1734_vm9 = vcmask 973824   ;;  %vm1860_vm10 = vcmask 965632  }
   0xe   : > { %s2845_s20 = sshll.u32 %s3866_s19, 4  ;;  %234 = vst.msk [vmem:[#allocation2 + $0x28] sm:$0xf] %vm233_vm11, %v3210_v10  ;;  %s3217_s29 = smov 120   ;;  %vm1986_vm11 = vcmask 957440  }
   0xf   : > { %s219_s23 = scalar_lea.vmem %s3859_s0, %s2845_s20  ;;  %s3218_s30 = smov 119  }
  0x10   : > { %v235_v0 = vld [vmem:[%s219_s23] sm:$0x1f]  ;;  %v236_v1 = vld [vmem:[%s219_s23 + $0x8] sm:$0x1f]  ;;  %s3214_s23 = smov 123   ;;  %s3219_s6 = smov 118  }
  0x11   : > { %v259_v2 = vrot.slane %v235_v0, 1  ;;  %v239_v3 = vrot.slane %v235_v0, 3  ;;  %v240_v4 = vrot.slane %v236_v1, 3  ;;  %v249_v5 = vrot.slane %v235_v0, 6  ;;  %s3220_s7 = smov 117   ;;  %s3221_s8 = smov 116  }
  0x12   : > { %v250_v6 = vrot.slane %v236_v1, 6  ;;  %v260_v8 = vrot.slane %v236_v1, 1  ;;  %s3222_s9 = smov 115   ;;  %s3224_s10 = smov 124  }
  0x13   : > { %261 = vrot.lane.b32.xlu1 %v259_v2, %s3208_s24  ;;  %v3036_v7 = vpack.i.bf16 %v240_v4, %v239_v3  ;;  %s3225_s11 = smov 113  }
  0x14   : > { %v3041_v9 = vpack.i.bf16 %v250_v6, %v249_v5 }
  0x15   : > { %3037 = vrot.lane.b32.xlu0 %v3036_v7, %s3209_s25 }
  0x17   : > { %263 = vrot.lane.b32.xlu1 %v260_v8, %s3208_s24 }
  0x19   : > { %3042 = vrot.lane.b32.xlu0 %v3041_v9, %s3211_s26 }
  0x1b   : > { %533 = vperm.xlu1 %3047, %v524_v11  }
  0x1d   : > { %528 = vperm.xlu0 %3046, %v523_v12  }
  0x1f   : > { %538 = vperm.xlu1 %3047, %v525_v14  }
  0x85   : > { %v262_v15 = vpop.permute.xlu1 %261 }
  0x87   : > { %v3038_v16 = vpop.permute.xlu0 %3037 }
  0x88   : > { %v3040_v17 = vunpack.i.h.bf16 %v3038_v16  ;;  %v3039_v18 = vunpack.i.l.bf16 %v3038_v16 }
  0x89   : > { %v264_v20 = vpop.permute.xlu1 %263 }
  0x8a   : > { %v246_v23 = vsel %vm245_vm0, %v3039_v18, %v3040_v17  ;;  %v266_v26 = vsel %vm265_vm1, %v262_v15, %v264_v20  ;;  %v271_v27 = vsel %vm269_vm4, %v236_v1, %v3040_v17 }
  0x8b   : > { %v3043_v19 = vpop.permute.xlu0 %3042  ;;  %v270_v31 = vsel %vm269_vm4, %v235_v0, %v246_v23  ;;  %vm1356_vm4 = vcmask 998400  }
  0x8c   : > { %v3045_v21 = vunpack.i.h.bf16 %v3043_v19  ;;  %v3044_v22 = vunpack.i.l.bf16 %v3043_v19 }
  0x8e   : > { %v256_v24 = vsel %vm255_vm2, %v3044_v22, %v3045_v21  ;;  %v274_v25 = vsel %vm272_vm3, %v3040_v17, %v3045_v21 }
  0x8f   : > { %v277_v28 = vsel %vm275_vm5, %v274_v25, %v264_v20  ;;  %v273_v29 = vsel %vm272_vm3, %v246_v23, %v256_v24  ;;  %vm1230_vm3 = vcmask 1006592  }
  0x90   : > { %v2846_v30 = vpack.c.bf16 %v277_v28, %v271_v27  ;;  %v276_v32 = vsel %vm275_vm5, %v273_v29, %v266_v26  ;;  %vm1482_vm5 = vcmask 990208  }
  0x91   : > { %v2848_v33 = vpack.c.bf16 %v276_v32, %v270_v31 }
  0x92   : > { %2847 = vmatprep.subr.bf16.mxu0 %v2846_v30 }
  0x93   : > { %2849 = vmatpush1.bf16.msra.mxu0 %v2848_v33  ;;  %v553_v33 = vld [vmem:[%s3863_s4] sm:$0x3] }
  0x94   : > { %2701 = vmatprep.subr.msk.mxu0 %vm339_vm6, %v264_v20  ;;  %v555_v20 = vlaneseq }
  0x96   : > { %v556_v25 = vshrl.u32 %v555_v20, 7 }
  0x97   : > { %2702 = vmatpush1.msk.msra.mxu0 %vm339_vm6, %v266_v26 }
  0x98   : > { %2703 = vmatmul.mubr.msk.f32.vlgmr.msra.gmra.mrb[0].mxu0 %vm293_vm7, %v278_v34  ;;  %v557_v30 = vsub.s32 0, %v556_v25  ;;  %v561_v34 = vsub.s32 1, %v556_v25 }
  0x99   : > { %414 = vmatprep.mubr.f32.mxu0 %v3210_v10 }
  0x9c   : > { %2704 = vmatmul.mubr.msk.f32.gmra.mrb[2].mxu0 %vm293_vm7, %v279_v35  ;;  %v529_v32 = vpop.permute.xlu0 %528 }
  0x9d   : > { %420 = vmatprep.mubr.f32.mxu0 %v3210_v10 }
  0xa0   : > { %2705 = vmatmul.mubr.msk.f32.gmra.mrb[4].mxu0 %vm293_vm7, %v280_v36 }
  0xa1   : > { %426 = vmatprep.mubr.f32.mxu0 %v3210_v10 }
  0xa4   : > { %2706 = vmatmul.mubr.msk.f32.gmra.mrb[6].mxu0 %vm293_vm7, %v281_v37 }
  0xa5   : > { %432 = vmatprep.mubr.f32.mxu0 %v3210_v10 }
  0xa8   : > { %2707 = vmatmul.mubr.msk.f32.gmra.mrb[8].mxu0 %vm293_vm7, %v282_v38 }
  0xa9   : > { %438 = vmatprep.mubr.f32.mxu0 %v3210_v10 }
  0xac   : > { %2708 = vmatmul.mubr.msk.f32.gmra.mrb[10].mxu0 %vm293_vm7, %v283_v39  ;;  %v558_v39 = vrot.slane %v553_v33, %v557_v30 }
  0xad   : > { %444 = vmatprep.mubr.f32.mxu0 %v3210_v10 }
  0xb0   : > { %2709 = vmatmul.mubr.msk.f32.gmra.mrb[12].mxu0 %vm293_vm7, %v284_v40  ;;  %v534_v40 = vpop.permute.xlu1 %533 }
  0xb1   : > { %450 = vmatprep.mubr.f32.mxu0 %v3210_v10 }
  0xb4   : > { %2710 = vmatmul.mubr.msk.f32.gmra.mrb[14].mxu0 %vm293_vm7, %v285_v41 }
  0xb5   : > { %456 = vmatprep.mubr.f32.mxu0 %v3210_v10 }
  0xb8   : > { %2711 = vmatmul.mubr.msk.f32.gmra.mrb[16].mxu0 %vm293_vm7, %v286_v42 }
  0xb9   : > { %462 = vmatprep.mubr.f32.mxu0 %v3210_v10 }
  0xbc   : > { %2712 = vmatmul.mubr.msk.f32.gmra.mrb[18].mxu0 %vm293_vm7, %v287_v43  ;;  %v562_v43 = vrot.slane %v553_v33, %v561_v34 }
  0xbd   : > { %468 = vmatprep.mubr.f32.mxu0 %v3210_v10 }
  0xc0   : > { %2713 = vmatmul.mubr.msk.f32.gmra.mrb[20].mxu0 %vm293_vm7, %v288_v44 }
  0xc1   : > { %474 = vmatprep.mubr.f32.mxu0 %v3210_v10 }
  0xc4   : > { %2714 = vmatmul.mubr.msk.f32.gmra.mrb[22].mxu0 %vm293_vm7, %v289_v45 }
  0xc5   : > { %480 = vmatprep.mubr.f32.mxu0 %v3210_v10 }
  0xc8   : > { %2715 = vmatmul.mubr.msk.f32.gmra.mrb[24].mxu0 %vm293_vm7, %v290_v46 }
  0xc9   : > { %486 = vmatprep.mubr.f32.mxu0 %v3210_v10 }
  0xcc   : > { %2716 = vmatmul.mubr.msk.f32.gmra.mrb[26].mxu0 %vm293_vm7, %v291_v47 }
  0xcd   : > { %492 = vmatprep.mubr.f32.mxu0 %v3210_v10 }
  0xd0   : > { %2717 = vmatmul.mubr.msk.f32.gmra.mrb[28].mxu0 %vm293_vm7, %v292_v48 }
  0xd1   : > { %723 = vmatprep.mubr.f32.mxu0 %v3210_v10 }
 0x16b   : > { %v410_v49 = vpop.f32.mrb[0].mxu0 }
 0x16c   : > { %v412_v50 = vpop.f32.mrb[1].mxu0 }
 0x16f   : > { %v416_v51 = vpop.f32.mrb[2].mxu0 }
 0x170   : > { %v418_v52 = vpop.f32.mrb[3].mxu0 }
 0x173   : > { %v422_v53 = vpop.f32.mrb[4].mxu0 }
 0x174   : > { %v424_v54 = vpop.f32.mrb[5].mxu0 }
 0x177   : > { %v428_v55 = vpop.f32.mrb[6].mxu0 }
 0x178   : > { %v499_v56 = vmax.f32 %v410_v49, %v428_v55  ;;  %v430_v57 = vpop.f32.mrb[7].mxu0 }
 0x179   : > { %v500_v58 = vmax.f32 %v412_v50, %v430_v57 }
 0x17b   : > { %v434_v59 = vpop.f32.mrb[8].mxu0 }
 0x17c   : > { %v501_v60 = vmax.f32 %v416_v51, %v434_v59  ;;  %v436_v61 = vpop.f32.mrb[9].mxu0 }
 0x17d   : > { %v502_v62 = vmax.f32 %v418_v52, %v436_v61 }
 0x17f   : > { %v440_v63 = vpop.f32.mrb[10].mxu0 }
 0x180   : > { %v503_v0 = vmax.f32 %v422_v53, %v440_v63  ;;  %v442_v1 = vpop.f32.mrb[11].mxu0 }
 0x181   : > { %v504_v2 = vmax.f32 %v424_v54, %v442_v1 }
 0x183   : > { %v446_v3 = vpop.f32.mrb[12].mxu0 }
 0x184   : > { %v505_v4 = vmax.f32 %v499_v56, %v446_v3  ;;  %v448_v5 = vpop.f32.mrb[13].mxu0 }
 0x185   : > { %v506_v6 = vmax.f32 %v500_v58, %v448_v5  ;;  %v539_v58 = vpop.permute.xlu1 %538 }
 0x187   : > { %v452_v7 = vpop.f32.mrb[14].mxu0 }
 0x188   : > { %v507_v8 = vmax.f32 %v501_v60, %v452_v7  ;;  %v454_v9 = vpop.f32.mrb[15].mxu0 }
 0x189   : > { %v508_v11 = vmax.f32 %v502_v62, %v454_v9 }
 0x18b   : > { %v458_v12 = vpop.f32.mrb[16].mxu0 }
 0x18c   : > { %v509_v13 = vmax.f32 %v503_v0, %v458_v12  ;;  %v460_v14 = vpop.f32.mrb[17].mxu0 }
 0x18d   : > { %v510_v15 = vmax.f32 %v504_v2, %v460_v14 }
 0x18f   : > { %v464_v16 = vpop.f32.mrb[18].mxu0 }
 0x190   : > { %v511_v17 = vmax.f32 %v505_v4, %v464_v16  ;;  %v466_v18 = vpop.f32.mrb[19].mxu0 }
 0x191   : > { %v512_v19 = vmax.f32 %v506_v6, %v466_v18 }
 0x193   : > { %v470_v21 = vpop.f32.mrb[20].mxu0 }
 0x194   : > { %v513_v22 = vmax.f32 %v507_v8, %v470_v21  ;;  %v472_v23 = vpop.f32.mrb[21].mxu0 }
 0x195   : > { %v514_v24 = vmax.f32 %v508_v11, %v472_v23 }
 0x197   : > { %v476_v26 = vpop.f32.mrb[22].mxu0 }
 0x198   : > { %v515_v27 = vmax.f32 %v509_v13, %v476_v26  ;;  %v478_v28 = vpop.f32.mrb[23].mxu0 }
 0x199   : > { %v516_v29 = vmax.f32 %v510_v15, %v478_v28 }
 0x19b   : > { %v482_v31 = vpop.f32.mrb[24].mxu0 }
 0x19c   : > { %v517_v35 = vmax.f32 %v511_v17, %v482_v31  ;;  %v484_v36 = vpop.f32.mrb[25].mxu0 }
 0x19d   : > { %v518_v37 = vmax.f32 %v512_v19, %v484_v36 }
 0x19e   : > { %v541_v38 = vadd.f32 %v529_v32, %v517_v35 }
 0x19f   : > { %v542_v41 = vadd.f32 %v529_v32, %v518_v37  ;;  %v488_v42 = vpop.f32.mrb[26].mxu0 }
 0x1a0   : > { %v547_v44 = vmax.f32 %v541_v38, 0.0  ;;  %v519_v45 = vmax.f32 %v513_v22, %v488_v42  ;;  %v490_v46 = vpop.f32.mrb[27].mxu0  ;;  %v2600_v42 = vld [vmem:[%s3862_s3] sm:$0xff] }
 0x1a1   : > { %v548_v47 = vmax.f32 %v542_v41, 0.0  ;;  %v520_v48 = vmax.f32 %v514_v24, %v490_v46  ;;  %v2756_v41 = vld [vmem:[%s3861_s2 + $0x80] sm:$0xff] }
 0x1a2   : > { %v543_v49 = vadd.f32 %v534_v40, %v519_v45  ;;  %v565_v50 = vmul.f32 %v558_v39, %v547_v44 }
 0x1a3   : > { %v544_v51 = vadd.f32 %v534_v40, %v520_v48  ;;  %v494_v52 = vpop.f32.mrb[28].mxu0  ;;  %v566_v53 = vmul.f32 %v562_v43, %v548_v47  ;;  %v3226_v47 = vmov 1  }
 0x1a4   : > { %v549_v54 = vmax.f32 %v543_v49, 0.0  ;;  %v521_v55 = vmax.f32 %v515_v27, %v494_v52  ;;  %577 = vrot.lane.b32.xlu0 %v565_v50, %s3213_s22  ;;  %v496_v56 = vpop.f32.mrb[29].mxu0  ;;  %3199 = vset.pattern.permute.xlu1 %v3226_v47 }
 0x1a5   : > { %v550_v57 = vmax.f32 %v544_v51, 0.0  ;;  %v522_v59 = vmax.f32 %v516_v29, %v496_v56  ;;  %579 = vrot.lane.b32.xlu1 %v566_v53, %s3213_s22  ;;  %3198 = vset.pattern.permute.xlu0 %v3226_v47 }
 0x1a6   : > { %v545_v60 = vadd.f32 %v539_v58, %v521_v55  ;;  %v567_v61 = vmul.f32 %v558_v39, %v549_v54  ;;  %v2757_v54 = vld [vmem:[%s3861_s2 + $0x88] sm:$0xf]  ;;  %v2602_v55 = vld [vmem:[%s3862_s3 + $0x10] sm:$0xf] }
 0x1a7   : > { %v546_v62 = vadd.f32 %v539_v58, %v522_v59  ;;  %v568_v63 = vmul.f32 %v562_v43, %v550_v57 }
 0x1a8   : > { %v551_v0 = vmax.f32 %v545_v60, 0.0  ;;  %581 = vrot.lane.b32.xlu0 %v567_v61, %s3213_s22  ;;  %v2763_v60 = vld [vmem:[%s3861_s2 + $0x90] sm:$0xff] }
 0x1a9   : > { %v552_v1 = vmax.f32 %v546_v62, 0.0  ;;  %583 = vrot.lane.b32.xlu1 %v568_v63, %s3213_s22 }
 0x1aa   : > { %v569_v2 = vmul.f32 %v558_v39, %v551_v0 }
 0x1ab   : > { %v570_v3 = vmul.f32 %v562_v43, %v552_v1  ;;  %v2601_v43 = vld [vmem:[%s3862_s3 + $0x8] sm:$0xff] }
 0x1ac   : > { %585 = vrot.lane.b32.xlu0 %v569_v2, %s3213_s22 }
 0x1ad   : > { %587 = vrot.lane.b32.xlu1 %v570_v3, %s3213_s22  ;;  %s3008_s22 = smul.u32 48, %s3866_s19 }
 0x216   : > { %v578_v4 = vpop.permute.xlu0 %577 }
 0x217   : > { %599 = vst.msk [vmem:[#allocation2] sm:$0xff] %vm598_vm12, %v578_v4  ;;  %v580_v5 = vpop.permute.xlu1 %579 }
 0x218   : > { %v589_v6 = vsel %vm225_vm8, %v578_v4, %v580_v5 }
 0x219   : > { %601 = vst.msk [vmem:[#allocation2 + $0x8] sm:$0xff] %vm600_vm13, %v589_v6  ;;  %v2764_v6 = vld [vmem:[%s3861_s2 + $0x98] sm:$0xff] }
 0x21a   : > { %v582_v7 = vpop.permute.xlu0 %581 }
 0x21b   : > { %602 = vst.msk [vmem:[#allocation2 + $0x10] sm:$0xff] %vm598_vm12, %v582_v7  ;;  %v584_v8 = vpop.permute.xlu1 %583  ;;  %vm2238_vm12 = vcmask 941056  }
 0x21c   : > { %v590_v9 = vsel %vm225_vm8, %v582_v7, %v584_v8 }
 0x21d   : > { %603 = vst.msk [vmem:[#allocation2 + $0x18] sm:$0xff] %vm600_vm13, %v590_v9  ;;  %vm1104_vm13 = vcmask 1014784  }
 0x21e   : > { %v586_v11 = vpop.permute.xlu0 %585  ;;  %v3379_v13 = vld [vmem:[#allocation2] sm:$0xff] }
 0x21f   : > { %605 = vst.msk [vmem:[#allocation2 + $0x20] sm:$0xf] %vm604_vm14, %v586_v11  ;;  %v588_v12 = vpop.permute.xlu1 %587 }
 0x220   : > { %v3381_v14 = vld [vmem:[#allocation2 + $0x8] sm:$0xff]  ;;  %v591_v15 = vsel %vm225_vm8, %v586_v11, %v588_v12  ;;  %vm1608_vm8 = vcmask 982016   ;;  %v2765_v12 = vld [vmem:[%s3861_s2 + $0xa0] sm:$0xf] }
 0x221   : > { %607 = vst.msk [vmem:[#allocation2 + $0x28] sm:$0xf] %vm606_vm15, %v591_v15  ;;  %v3386_v16 = vpack.i.bf16 %v3381_v14, %v3379_v13 }
 0x222   : > { %v3389_v17 = vld [vmem:[#allocation2 + $0x10] sm:$0xff] }
 0x223   : > { %3049 = vrot.lane.b32.xlu0 %v3386_v16, %s3214_s23  ;;  %v2856_v22 = vpack.c.bf16 %v3389_v17, %v3379_v13 }
 0x224   : > { %v3391_v18 = vld [vmem:[#allocation2 + $0x18] sm:$0xff] }
 0x225   : > { %v3395_v19 = vpack.i.bf16 %v3391_v18, %v3389_v17  ;;  %v2854_v21 = vpack.c.bf16 %v3391_v18, %v3381_v14  ;;  %v2796_v14 = vld [vmem:[%s3861_s2 + $0xf8] sm:$0xff] }
 0x226   : > { %v3397_v20 = vld [vmem:[#allocation2 + $0x20] sm:$0xf] }
 0x227   : > { %1226 = vrot.lane.b32.xlu0 %v3397_v20, %s3214_s23  ;;  %3054 = vrot.lane.b32.xlu1 %v3395_v19, %s3214_s23 }
 0x228   : > { %v3405_v23 = vld [vmem:[#allocation2 + $0x28] sm:$0xf] }
 0x22b   : > { %3059 = vrot.lane.b32.xlu0 %v3386_v16, %s3215_s27  ;;  %1228 = vrot.lane.b32.xlu1 %v3405_v23, %s3214_s23 }
 0x22f   : > { %1352 = vrot.lane.b32.xlu0 %v3397_v20, %s3215_s27  ;;  %3064 = vrot.lane.b32.xlu1 %v3395_v19, %s3215_s27 }
 0x233   : > { %3069 = vrot.lane.b32.xlu0 %v3386_v16, %s3216_s28  ;;  %1354 = vrot.lane.b32.xlu1 %v3405_v23, %s3215_s27 }
 0x237   : > { %1478 = vrot.lane.b32.xlu0 %v3397_v20, %s3216_s28  ;;  %3074 = vrot.lane.b32.xlu1 %v3395_v19, %s3216_s28 }
 0x23b   : > { %3079 = vrot.lane.b32.xlu0 %v3386_v16, %s3217_s29  ;;  %1480 = vrot.lane.b32.xlu1 %v3405_v23, %s3216_s28  ;;  %s224_s28 = scalar_lea.vmem %s3864_s5, %s3008_s22 }
 0x23f   : > { %1604 = vrot.lane.b32.xlu0 %v3397_v20, %s3217_s29  ;;  %3084 = vrot.lane.b32.xlu1 %v3395_v19, %s3217_s29 }
 0x243   : > { %3089 = vrot.lane.b32.xlu0 %v3386_v16, %s3218_s30  ;;  %3094 = vrot.lane.b32.xlu1 %v3395_v19, %s3218_s30 }
 0x247   : > { %1730 = vrot.lane.b32.xlu0 %v3397_v20, %s3218_s30  ;;  %1606 = vrot.lane.b32.xlu1 %v3405_v23, %s3217_s29 }
 0x24b   : > { %3099 = vrot.lane.b32.xlu0 %v3386_v16, %s3219_s6  ;;  %3104 = vrot.lane.b32.xlu1 %v3395_v19, %s3219_s6 }
 0x24f   : > { %1856 = vrot.lane.b32.xlu0 %v3397_v20, %s3219_s6  ;;  %3114 = vrot.lane.b32.xlu1 %v3395_v19, %s3209_s25 }
 0x253   : > { %3109 = vrot.lane.b32.xlu0 %v3386_v16, %s3209_s25  ;;  %1732 = vrot.lane.b32.xlu1 %v3405_v23, %s3218_s30 }
 0x257   : > { %3119 = vrot.lane.b32.xlu0 %v3386_v16, %s3220_s7  ;;  %3124 = vrot.lane.b32.xlu1 %v3395_v19, %s3220_s7 }
 0x25b   : > { %635 = vrot.lane.b32.xlu0 %v3397_v20, %s3209_s25  ;;  %3134 = vrot.lane.b32.xlu1 %v3395_v19, %s3221_s8 }
 0x25f   : > { %1982 = vrot.lane.b32.xlu0 %v3397_v20, %s3220_s7  ;;  %1858 = vrot.lane.b32.xlu1 %v3405_v23, %s3219_s6 }
 0x263   : > { %3129 = vrot.lane.b32.xlu0 %v3386_v16, %s3221_s8  ;;  %3144 = vrot.lane.b32.xlu1 %v3395_v19, %s3211_s26 }
 0x267   : > { %2108 = vrot.lane.b32.xlu0 %v3397_v20, %s3221_s8  ;;  %637 = vrot.lane.b32.xlu1 %v3405_v23, %s3209_s25  ;;  %s3223_s25 = smov 114  }
 0x26b   : > { %3139 = vrot.lane.b32.xlu0 %v3386_v16, %s3211_s26  ;;  %1984 = vrot.lane.b32.xlu1 %v3405_v23, %s3220_s7 }
 0x26f   : > { %3149 = vrot.lane.b32.xlu0 %v3386_v16, %s3222_s9  ;;  %3154 = vrot.lane.b32.xlu1 %v3395_v19, %s3222_s9 }
 0x273   : > { %850 = vrot.lane.b32.xlu0 %v3397_v20, %s3211_s26  ;;  %3164 = vrot.lane.b32.xlu1 %v3395_v19, %s3208_s24 }
 0x277   : > { %2234 = vrot.lane.b32.xlu0 %v3397_v20, %s3222_s9  ;;  %2110 = vrot.lane.b32.xlu1 %v3405_v23, %s3221_s8 }
 0x27b   : > { %3159 = vrot.lane.b32.xlu0 %v3386_v16, %s3208_s24  ;;  %3174 = vrot.lane.b32.xlu1 %v3395_v19, %s3223_s25 }
 0x27f   : > { %3169 = vrot.lane.b32.xlu0 %v3386_v16, %s3223_s25  ;;  %852 = vrot.lane.b32.xlu1 %v3405_v23, %s3211_s26 }
 0x283   : > { %975 = vrot.lane.b32.xlu0 %v3397_v20, %s3208_s24  ;;  %2236 = vrot.lane.b32.xlu1 %v3405_v23, %s3222_s9 }
 0x287   : > { %2360 = vrot.lane.b32.xlu0 %v3397_v20, %s3223_s25  ;;  %3184 = vrot.lane.b32.xlu1 %v3395_v19, %s3224_s10 }
 0x28b   : > { %3179 = vrot.lane.b32.xlu0 %v3386_v16, %s3224_s10  ;;  %977 = vrot.lane.b32.xlu1 %v3405_v23, %s3208_s24 }
 0x28f   : > { %3189 = vrot.lane.b32.xlu0 %v3386_v16, %s3225_s11  ;;  %2362 = vrot.lane.b32.xlu1 %v3405_v23, %s3223_s25 }
 0x293   : > { %1100 = vrot.lane.b32.xlu0 %v3397_v20, %s3224_s10  ;;  %3194 = vrot.lane.b32.xlu1 %v3395_v19, %s3225_s11 }
 0x295   : > { %v3050_v24 = vpop.permute.xlu0 %3049 }
 0x296   : > { %v3052_v25 = vunpack.i.h.bf16 %v3050_v24  ;;  %v3051_v26 = vunpack.i.l.bf16 %v3050_v24 }
 0x297   : > { %2486 = vrot.lane.b32.xlu0 %v3397_v20, %s3225_s11  ;;  %1102 = vrot.lane.b32.xlu1 %v3405_v23, %s3224_s10 }
 0x298   : > { %v1231_v32 = vsel %vm1230_vm3, %v3051_v26, %v3052_v25 }
 0x299   : > { %v1227_v27 = vpop.permute.xlu0 %1226  ;;  %v3055_v28 = vpop.permute.xlu1 %3054 }
 0x29a   : > { %v3057_v29 = vunpack.i.h.bf16 %v3055_v28  ;;  %v3056_v30 = vunpack.i.l.bf16 %v3055_v28 }
 0x29b   : > { %2488 = vrot.lane.b32.xlu1 %v3405_v23, %s3225_s11  ;;  %2605 = vperm.xlu0 %3198, %v2600_v42  }
 0x29c   : > { %v3476_v31 = vpack.c.bf16 %v3057_v29, %v3052_v25  ;;  %v1232_v33 = vsel %vm1230_vm3, %v3056_v30, %v3057_v29  ;;  %v2771_v30 = vld [vmem:[%s3861_s2 + $0xa8] sm:$0xff] }
 0x29d   : > { %v3060_v34 = vpop.permute.xlu0 %3059  ;;  %v3480_v35 = vpop.permute.xlu1 %1228  ;;  %v3482_v36 = vpack.c.bf16 %v1232_v33, %v1231_v32 }
 0x29e   : > { %2914 = vmatprep.subr.bf16.mxu1 %v3476_v31  ;;  %v3062_v37 = vunpack.i.h.bf16 %v3060_v34  ;;  %v3061_v38 = vunpack.i.l.bf16 %v3060_v34  ;;  %v3499_v46 = vsel %vm1230_vm3, %v1227_v27, %v3480_v35 }
 0x29f   : > { %2916 = vmatpush1.bf16.msra.mxu1 %v3482_v36  ;;  %2610 = vperm.xlu1 %3199, %v2601_v43  }
 0x2a0   : > { %2915 = vmatprep.subr.msk.mxu1 %vm339_vm6, %v3480_v35  ;;  %v1357_v49 = vsel %vm1356_vm4, %v3061_v38, %v3062_v37  ;;  %v2772_v38 = vld [vmem:[%s3861_s2 + $0xb0] sm:$0xff] }
 0x2a1   : > { %v1353_v39 = vpop.permute.xlu0 %1352  ;;  %v3065_v40 = vpop.permute.xlu1 %3064 }
 0x2a2   : > { %v3067_v44 = vunpack.i.h.bf16 %v3065_v40  ;;  %v3066_v45 = vunpack.i.l.bf16 %v3065_v40 }
 0x2a3   : > { %2917 = vmatpush1.msk.msra.mxu1 %vm339_vm6, %v3499_v46  ;;  %2615 = vperm.xlu1 %3199, %v2602_v55  }
 0x2a4   : > { %v2874_v48 = vpack.c.bf16 %v3067_v44, %v3062_v37  ;;  %2761 = vmatmul.mubr.msk.f32.vlgmr.msra.gmra.mrb[0].mxu1 %vm293_vm7, %v2756_v41  ;;  %v1358_v50 = vsel %vm1356_vm4, %v3066_v45, %v3067_v44  ;;  %v2773_v45 = vld [vmem:[%s3861_s2 + $0xb8] sm:$0xf] }
 0x2a5   : > { %v3070_v51 = vpop.permute.xlu0 %3069  ;;  %v1355_v52 = vpop.permute.xlu1 %1354  ;;  %v2876_v53 = vpack.c.bf16 %v1358_v50, %v1357_v49  ;;  %1327 = vmatprep.mubr.f32.mxu1 %v3210_v10 }
 0x2a6   : > { %2875 = vmatprep.subr.bf16.mxu1 %v2874_v48  ;;  %v3072_v56 = vunpack.i.h.bf16 %v3070_v51  ;;  %v3071_v57 = vunpack.i.l.bf16 %v3070_v51  ;;  %v1359_v61 = vsel %vm1356_vm4, %v1353_v39, %v1355_v52  ;;  %v2779_v51 = vld [vmem:[%s3861_s2 + $0xc0] sm:$0xff] }
 0x2a7   : > { %2877 = vmatpush1.bf16.msra.mxu1 %v2876_v53 }
 0x2a8   : > { %2762 = vmatmul.mubr.msk.f32.gmra.mrb[2].mxu1 %vm293_vm7, %v2757_v54  ;;  %2766 = vmatprep.subr.msk.mxu1 %vm339_vm6, %v1355_v52  ;;  %v1483_v1 = vsel %vm1482_vm5, %v3071_v57, %v3072_v56 }
 0x2a9   : > { %v1479_v58 = vpop.permute.xlu0 %1478  ;;  %v3075_v59 = vpop.permute.xlu1 %3074  ;;  %1441 = vmatprep.mubr.f32.mxu1 %v3210_v10 }
 0x2aa   : > { %v3077_v62 = vunpack.i.h.bf16 %v3075_v59  ;;  %v3076_v63 = vunpack.i.l.bf16 %v3075_v59  ;;  %v2780_v59 = vld [vmem:[%s3861_s2 + $0xc8] sm:$0xff] }
 0x2ab   : > { %2767 = vmatpush1.msk.msra.mxu1 %vm339_vm6, %v1359_v61 }
 0x2ac   : > { %v2878_v0 = vpack.c.bf16 %v3077_v62, %v3072_v56  ;;  %2768 = vmatmul.mubr.msk.f32.vlgmr.msra.gmra.mrb[4].mxu1 %vm293_vm7, %v2763_v60  ;;  %v1484_v2 = vsel %vm1482_vm5, %v3076_v63, %v3077_v62 }
 0x2ad   : > { %v3080_v3 = vpop.permute.xlu0 %3079  ;;  %v1481_v4 = vpop.permute.xlu1 %1480  ;;  %v2880_v5 = vpack.c.bf16 %v1484_v2, %v1483_v1  ;;  %1447 = vmatprep.mubr.f32.mxu1 %v3210_v10 }
 0x2ae   : > { %2879 = vmatprep.subr.bf16.mxu1 %v2878_v0  ;;  %v3082_v7 = vunpack.i.h.bf16 %v3080_v3  ;;  %v3081_v8 = vunpack.i.l.bf16 %v3080_v3  ;;  %v1485_v15 = vsel %vm1482_vm5, %v1479_v58, %v1481_v4 }
 0x2af   : > { %2881 = vmatpush1.bf16.msra.mxu1 %v2880_v5 }
 0x2b0   : > { %2769 = vmatmul.mubr.msk.f32.gmra.mrb[0].mxu1 %vm293_vm7, %v2764_v6  ;;  %2774 = vmatprep.subr.msk.mxu1 %vm339_vm6, %v1481_v4  ;;  %v1609_v24 = vsel %vm1608_vm8, %v3081_v8, %v3082_v7  ;;  %v2781_v8 = vld [vmem:[%s3861_s2 + $0xd0] sm:$0xf] }
 0x2b1   : > { %v1605_v9 = vpop.permute.xlu0 %1604  ;;  %v3085_v11 = vpop.permute.xlu1 %3084  ;;  %1453 = vmatprep.mubr.f32.mxu1 %v3210_v10 }
 0x2b2   : > { %v3087_v16 = vunpack.i.h.bf16 %v3085_v11  ;;  %v3086_v19 = vunpack.i.l.bf16 %v3085_v11 }
 0x2b3   : > { %2775 = vmatpush1.msk.msra.mxu1 %vm339_vm6, %v1485_v15 }
 0x2b4   : > { %v2882_v25 = vpack.c.bf16 %v3087_v16, %v3082_v7  ;;  %v1610_v26 = vsel %vm1608_vm8, %v3086_v19, %v3087_v16  ;;  %2770 = vmatmul.mubr.msk.f32.gmra.mrb[2].mxu1 %vm293_vm7, %v2765_v12  ;;  %v2787_v16 = vld [vmem:[%s3861_s2 + $0xd8] sm:$0xff] }
 0x2b5   : > { %v2884_v27 = vpack.c.bf16 %v1610_v26, %v1609_v24  ;;  %v3090_v28 = vpop.permute.xlu0 %3089  ;;  %v3095_v29 = vpop.permute.xlu1 %3094  ;;  %1567 = vmatprep.mubr.f32.mxu1 %v3210_v10 }
 0x2b6   : > { %2883 = vmatprep.subr.bf16.mxu1 %v2882_v25  ;;  %v3092_v32 = vunpack.i.h.bf16 %v3090_v28  ;;  %v3097_v33 = vunpack.i.h.bf16 %v3095_v29  ;;  %v3091_v40 = vunpack.i.l.bf16 %v3090_v28  ;;  %v3096_v42 = vunpack.i.l.bf16 %v3095_v29  ;;  %v2788_v28 = vld [vmem:[%s3861_s2 + $0xe0] sm:$0xff] }
 0x2b8   : > { %2776 = vmatmul.mubr.msk.f32.vlgmr.msra.gmra.mrb[4].mxu1 %vm293_vm7, %v2771_v30  ;;  %v2886_v41 = vpack.c.bf16 %v3097_v33, %v3092_v32  ;;  %v1735_v47 = vsel %vm1734_vm9, %v3091_v40, %v3092_v32  ;;  %v1736_v48 = vsel %vm1734_vm9, %v3096_v42, %v3097_v33 }
 0x2b9   : > { %2885 = vmatpush1.bf16.msra.mxu1 %v2884_v27  ;;  %v1731_v34 = vpop.permute.xlu0 %1730  ;;  %v1607_v37 = vpop.permute.xlu1 %1606  ;;  %1573 = vmatprep.mubr.f32.mxu1 %v3210_v10  ;;  %v2888_v52 = vpack.c.bf16 %v1736_v48, %v1735_v47 }
 0x2ba   : > { %v1611_v39 = vsel %vm1608_vm8, %v1605_v9, %v1607_v37  ;;  %2782 = vmatprep.subr.msk.mxu1 %vm339_vm6, %v1607_v37 }
 0x2bc   : > { %2777 = vmatmul.mubr.msk.f32.gmra.mrb[0].mxu1 %vm293_vm7, %v2772_v38  ;;  %v2789_v38 = vld [vmem:[%s3861_s2 + $0xe8] sm:$0xf] }
 0x2bd   : > { %2783 = vmatpush1.msk.msra.mxu1 %vm339_vm6, %v1611_v39  ;;  %v3100_v43 = vpop.permute.xlu0 %3099  ;;  %v3105_v44 = vpop.permute.xlu1 %3104  ;;  %1579 = vmatprep.mubr.f32.mxu1 %v3210_v10 }
 0x2be   : > { %2887 = vmatprep.subr.bf16.mxu1 %v2886_v41  ;;  %v3102_v53 = vunpack.i.h.bf16 %v3100_v43  ;;  %v3107_v54 = vunpack.i.h.bf16 %v3105_v44  ;;  %v3101_v63 = vunpack.i.l.bf16 %v3100_v43  ;;  %v3106_v0 = vunpack.i.l.bf16 %v3105_v44  ;;  %v2718_v43 = vld [vmem:[%s3861_s2 + $0x18] sm:$0xff] }
 0x2c0   : > { %2778 = vmatmul.mubr.msk.f32.gmra.mrb[2].mxu1 %vm293_vm7, %v2773_v45  ;;  %v2890_v1 = vpack.c.bf16 %v3107_v54, %v3102_v53  ;;  %v1861_v9 = vsel %vm1860_vm10, %v3101_v63, %v3102_v53  ;;  %v1862_v11 = vsel %vm1860_vm10, %v3106_v0, %v3107_v54  ;;  %v2795_v45 = vld [vmem:[%s3861_s2 + $0xf0] sm:$0xff]  ;;  %v608_v63 = vld [vmem:[%s3861_s2] sm:$0xff] }
 0x2c1   : > { %v1857_v49 = vpop.permute.xlu0 %1856  ;;  %v3115_v50 = vpop.permute.xlu1 %3114  ;;  %1693 = vmatprep.mubr.f32.mxu1 %v3210_v10  ;;  %v2892_v19 = vpack.c.bf16 %v1862_v11, %v1861_v9  ;;  %v609_v9 = vld [vmem:[%s3861_s2 + $0x8] sm:$0xff]  ;;  %v2804_v11 = vld [vmem:[%s3861_s2 + $0x110] sm:$0xff] }
 0x2c2   : > { %v3117_v55 = vunpack.i.h.bf16 %v3115_v50  ;;  %v3116_v56 = vunpack.i.l.bf16 %v3115_v50 }
 0x2c4   : > { %2784 = vmatmul.mubr.msk.f32.vlgmr.msra.gmra.mrb[4].mxu1 %vm293_vm7, %v2779_v51  ;;  %v640_v2 = vsel %vm245_vm0, %v3116_v56, %v3117_v55  ;;  %v2719_v51 = vld [vmem:[%s3861_s2 + $0x20] sm:$0xff]  ;;  %v2720_v56 = vld [vmem:[%s3861_s2 + $0x28] sm:$0xf] }
 0x2c5   : > { %2889 = vmatpush1.bf16.msra.mxu1 %v2888_v52  ;;  %v3110_v57 = vpop.permute.xlu0 %3109  ;;  %v1733_v58 = vpop.permute.xlu1 %1732  ;;  %1699 = vmatprep.mubr.f32.mxu1 %v3210_v10 }
 0x2c6   : > { %v3112_v60 = vunpack.i.h.bf16 %v3110_v57  ;;  %v3111_v61 = vunpack.i.l.bf16 %v3110_v57  ;;  %v1737_v62 = vsel %vm1734_vm9, %v1731_v34, %v1733_v58  ;;  %2790 = vmatprep.subr.msk.mxu1 %vm339_vm6, %v1733_v58  ;;  %v2797_v58 = vld [vmem:[%s3861_s2 + $0x100] sm:$0xf] }
 0x2c8   : > { %v639_v3 = vsel %vm245_vm0, %v3111_v61, %v3112_v60  ;;  %v2850_v4 = vpack.c.bf16 %v3117_v55, %v3112_v60  ;;  %2785 = vmatmul.mubr.msk.f32.gmra.mrb[0].mxu1 %vm293_vm7, %v2780_v59 }
 0x2c9   : > { %v2852_v5 = vpack.c.bf16 %v640_v2, %v639_v3  ;;  %2791 = vmatpush1.msk.msra.mxu1 %vm339_vm6, %v1737_v62  ;;  %v3120_v6 = vpop.permute.xlu0 %3119  ;;  %v3125_v7 = vpop.permute.xlu1 %3124  ;;  %1705 = vmatprep.mubr.f32.mxu1 %v3210_v10 }
 0x2ca   : > { %2891 = vmatprep.subr.bf16.mxu1 %v2890_v1  ;;  %2851 = vmatprep.subr.bf16.mxu0 %v2850_v4  ;;  %v3122_v24 = vunpack.i.h.bf16 %v3120_v6  ;;  %v3127_v25 = vunpack.i.h.bf16 %v3125_v7  ;;  %v3121_v32 = vunpack.i.l.bf16 %v3120_v6  ;;  %v3126_v33 = vunpack.i.l.bf16 %v3125_v7  ;;  %v2803_v1 = vld [vmem:[%s3861_s2 + $0x108] sm:$0xff] }
 0x2cb   : > { %2853 = vmatpush1.bf16.msra.mxu0 %v2852_v5 }
 0x2cc   : > { %2786 = vmatmul.mubr.msk.f32.gmra.mrb[2].mxu1 %vm293_vm7, %v2781_v8  ;;  %v2894_v30 = vpack.c.bf16 %v3127_v25, %v3122_v24  ;;  %v1987_v39 = vsel %vm1986_vm11, %v3121_v32, %v3122_v24  ;;  %v1988_v40 = vsel %vm1986_vm11, %v3126_v33, %v3127_v25  ;;  %v2805_v32 = vld [vmem:[%s3861_s2 + $0x118] sm:$0xf] }
 0x2cd   : > { %v636_v12 = vpop.permute.xlu0 %635  ;;  %v3581_v15 = vpop.permute.xlu1 %3134  ;;  %1819 = vmatprep.mubr.f32.mxu1 %v3210_v10  ;;  %v2896_v47 = vpack.c.bf16 %v1988_v40, %v1987_v39  ;;  %v2731_v40 = vld [vmem:[%s3861_s2 + $0x30] sm:$0xff] }
 0x2ce   : > { %v3137_v18 = vunpack.i.h.bf16 %v3581_v15  ;;  %v3136_v59 = vunpack.i.l.bf16 %v3581_v15 }
 0x2d0   : > { %2792 = vmatmul.mubr.msk.f32.vlgmr.msra.gmra.mrb[4].mxu1 %vm293_vm7, %v2787_v16 }
 0x2d1   : > { %2893 = vmatpush1.bf16.msra.mxu1 %v2892_v19  ;;  %v1983_v26 = vpop.permute.xlu0 %1982  ;;  %v1859_v27 = vpop.permute.xlu1 %1858  ;;  %1825 = vmatprep.mubr.f32.mxu1 %v3210_v10 }
 0x2d2   : > { %v1863_v29 = vsel %vm1860_vm10, %v1857_v49, %v1859_v27  ;;  %2798 = vmatprep.subr.msk.mxu1 %vm339_vm6, %v1859_v27 }
 0x2d4   : > { %2793 = vmatmul.mubr.msk.f32.gmra.mrb[0].mxu1 %vm293_vm7, %v2788_v28 }
 0x2d5   : > { %2799 = vmatpush1.msk.msra.mxu1 %vm339_vm6, %v1863_v29  ;;  %v3130_v34 = vpop.permute.xlu0 %3129  ;;  %v3596_v37 = vpop.permute.xlu1 %3144  ;;  %1831 = vmatprep.mubr.f32.mxu1 %v3210_v10 }
 0x2d6   : > { %2895 = vmatprep.subr.bf16.mxu1 %v2894_v30  ;;  %v3132_v48 = vunpack.i.h.bf16 %v3130_v34  ;;  %v3147_v52 = vunpack.i.h.bf16 %v3596_v37  ;;  %v3146_v57 = vunpack.i.l.bf16 %v3596_v37 }
 0x2d8   : > { %2794 = vmatmul.mubr.msk.f32.gmra.mrb[2].mxu1 %vm293_vm7, %v2789_v38  ;;  %v855_v0 = vsel %vm255_vm2, %v3146_v57, %v3147_v52 }
 0x2d9   : > { %v3605_v41 = vpop.permute.xlu0 %2108  ;;  %v638_v42 = vpop.permute.xlu1 %637  ;;  %1945 = vmatprep.mubr.f32.mxu1 %v3210_v10 }
 0x2da   : > { %v641_v44 = vsel %vm245_vm0, %v636_v12, %v638_v42  ;;  %2721 = vmatprep.subr.msk.mxu0 %vm339_vm6, %v638_v42  ;;  %vm2112_vm0 = vcmask 949248  }
 0x2db   : > { %2722 = vmatpush1.msk.msra.mxu0 %vm339_vm6, %v641_v44  ;;  %v2114_v2 = vsel %vm2112_vm0, %v3136_v59, %v3137_v18  ;;  %v2811_v44 = vld [vmem:[%s3861_s2 + $0x120] sm:$0xff] }
 0x2dc   : > { %2723 = vmatmul.mubr.msk.f32.vlgmr.msra.gmra.mrb[30].mxu0 %vm293_vm7, %v2718_v43  ;;  %2855 = vmatprep.subr.bf16.mxu0 %v2854_v21 }
 0x2dd   : > { %2800 = vmatmul.mubr.msk.f32.vlgmr.msra.gmra.mrb[4].mxu1 %vm293_vm7, %v2795_v45  ;;  %v3140_v49 = vpop.permute.xlu0 %3139  ;;  %v1985_v50 = vpop.permute.xlu1 %1984  ;;  %2857 = vmatpush1.bf16.msra.mxu0 %v2856_v22  ;;  %v3131_v22 = vunpack.i.l.bf16 %v3130_v34 }
 0x2de   : > { %2897 = vmatpush1.bf16.msra.mxu1 %v2896_v47  ;;  %v3142_v53 = vunpack.i.h.bf16 %v3140_v49  ;;  %2726 = vmatprep.subr.msk.mxu0 %vm339_vm6, %v3405_v23  ;;  %v1989_v13 = vsel %vm1986_vm11, %v1983_v26, %v1985_v50  ;;  %v3141_v17 = vunpack.i.l.bf16 %v3140_v49  ;;  %v2898_v23 = vpack.c.bf16 %v3137_v18, %v3132_v48  ;;  %v610_v26 = vld [vmem:[%s3861_s2 + $0x10] sm:$0xf] }
 0x2df   : > { %2806 = vmatprep.subr.msk.mxu1 %vm339_vm6, %v1985_v50  ;;  %729 = vmatprep.mubr.f32.mxu0 %v3210_v10  ;;  %v2113_v60 = vsel %vm2112_vm0, %v3131_v22, %v3132_v48  ;;  %v2733_v22 = vld [vmem:[%s3861_s2 + $0x40] sm:$0xf] }
 0x2e0   : > { %v2858_v21 = vpack.c.bf16 %v3147_v52, %v3142_v53  ;;  %1951 = vmatprep.mubr.f32.mxu1 %v3210_v10  ;;  %2724 = vmatmul.mubr.msk.f32.gmra.mrb[32].mxu0 %vm293_vm7, %v2719_v51  ;;  %v2900_v4 = vpack.c.bf16 %v2114_v2, %v2113_v60  ;;  %v2732_v51 = vld [vmem:[%s3861_s2 + $0x38] sm:$0xff]  ;;  %v2812_v52 = vld [vmem:[%s3861_s2 + $0x128] sm:$0xff] }
 0x2e1   : > { %2801 = vmatmul.mubr.msk.f32.gmra.mrb[0].mxu1 %vm293_vm7, %v2796_v14  ;;  %v3641_v54 = vpop.permute.xlu0 %3149  ;;  %v3643_v55 = vpop.permute.xlu1 %3154  ;;  %2727 = vmatpush1.msk.msra.mxu0 %vm339_vm6, %v3397_v20  ;;  %v854_v20 = vsel %vm255_vm2, %v3141_v17, %v3142_v53 }
 0x2e2   : > { %2807 = vmatpush1.msk.msra.mxu1 %vm339_vm6, %v1989_v13  ;;  %2859 = vmatprep.subr.bf16.mxu0 %v2858_v21  ;;  %v2860_v3 = vpack.c.bf16 %v855_v0, %v854_v20  ;;  %v3152_v5 = vunpack.i.h.bf16 %v3641_v54  ;;  %v3157_v6 = vunpack.i.h.bf16 %v3643_v55  ;;  %v3151_v15 = vunpack.i.l.bf16 %v3641_v54  ;;  %v2739_v20 = vld [vmem:[%s3861_s2 + $0x48] sm:$0xff] }
 0x2e3   : > { %2899 = vmatprep.subr.bf16.mxu1 %v2898_v23  ;;  %735 = vmatprep.mubr.f32.mxu0 %v3210_v10  ;;  %v3156_v19 = vunpack.i.l.bf16 %v3643_v55  ;;  %v2813_v23 = vld [vmem:[%s3861_s2 + $0x130] sm:$0xf] }
 0x2e4   : > { %1957 = vmatprep.mubr.f32.mxu1 %v3210_v10  ;;  %2725 = vmatmul.mubr.msk.f32.gmra.mrb[34].mxu0 %vm293_vm7, %v2720_v56  ;;  %v2902_v16 = vpack.c.bf16 %v3157_v6, %v3152_v5  ;;  %v2239_v34 = vsel %vm2238_vm12, %v3151_v15, %v3152_v5 }
 0x2e5   : > { %2802 = vmatmul.mubr.msk.f32.gmra.mrb[2].mxu1 %vm293_vm7, %v2797_v58  ;;  %v851_v61 = vpop.permute.xlu0 %850  ;;  %v3165_v62 = vpop.permute.xlu1 %3164  ;;  %819 = vmatprep.mubr.f32.mxu0 %v3210_v10  ;;  %v2240_v37 = vsel %vm2238_vm12, %v3156_v19, %v3157_v6  ;;  %v2741_v19 = vld [vmem:[%s3861_s2 + $0x58] sm:$0xf] }
 0x2e6   : > { %2071 = vmatprep.mubr.f32.mxu1 %v3210_v10  ;;  %v3167_v27 = vunpack.i.h.bf16 %v3165_v62  ;;  %v3166_v28 = vunpack.i.l.bf16 %v3165_v62  ;;  %v2904_v47 = vpack.c.bf16 %v2240_v37, %v2239_v34 }
 0x2e8   : > { %2728 = vmatmul.mubr.msk.f32.vlgmr.msra.gmra.mrb[30].mxu0 %vm293_vm7, %v608_v63  ;;  %v2819_v63 = vld [vmem:[%s3861_s2 + $0x138] sm:$0xff] }
 0x2e9   : > { %2861 = vmatpush1.bf16.msra.mxu0 %v2860_v3  ;;  %2808 = vmatmul.mubr.msk.f32.vlgmr.msra.gmra.mrb[4].mxu1 %vm293_vm7, %v2803_v1  ;;  %v2235_v7 = vpop.permute.xlu0 %2234  ;;  %v2111_v8 = vpop.permute.xlu1 %2110 }
 0x2ea   : > { %2901 = vmatpush1.bf16.msra.mxu1 %v2900_v4  ;;  %825 = vmatprep.mubr.f32.mxu0 %v3210_v10  ;;  %v2115_v12 = vsel %vm2112_vm0, %v3605_v41, %v2111_v8  ;;  %v980_v41 = vsel %vm265_vm1, %v3166_v28, %v3167_v27 }
 0x2eb   : > { %2814 = vmatprep.subr.msk.mxu1 %vm339_vm6, %v2111_v8  ;;  %2077 = vmatprep.mubr.f32.mxu1 %v3210_v10 }
 0x2ec   : > { %2729 = vmatmul.mubr.msk.f32.gmra.mrb[32].mxu0 %vm293_vm7, %v609_v9  ;;  %v2820_v9 = vld [vmem:[%s3861_s2 + $0x140] sm:$0xff] }
 0x2ed   : > { %2809 = vmatmul.mubr.msk.f32.gmra.mrb[0].mxu1 %vm293_vm7, %v2804_v11  ;;  %v3160_v24 = vpop.permute.xlu0 %3159  ;;  %v3691_v25 = vpop.permute.xlu1 %3174  ;;  %831 = vmatprep.mubr.f32.mxu0 %v3210_v10 }
 0x2ee   : > { %2815 = vmatpush1.msk.msra.mxu1 %vm339_vm6, %v2115_v12  ;;  %v3162_v29 = vunpack.i.h.bf16 %v3160_v24  ;;  %v3161_v30 = vunpack.i.l.bf16 %v3160_v24  ;;  %2083 = vmatprep.mubr.f32.mxu1 %v3210_v10  ;;  %v3177_v53 = vunpack.i.h.bf16 %v3691_v25  ;;  %v3176_v54 = vunpack.i.l.bf16 %v3691_v25 }
 0x2ef   : > { %2903 = vmatprep.subr.bf16.mxu1 %v2902_v16 }
 0x2f0   : > { %v979_v33 = vsel %vm265_vm1, %v3161_v30, %v3162_v29  ;;  %2730 = vmatmul.mubr.msk.f32.gmra.mrb[34].mxu0 %vm293_vm7, %v610_v26  ;;  %v2862_v42 = vpack.c.bf16 %v3167_v27, %v3162_v29  ;;  %v2821_v26 = vld [vmem:[%s3861_s2 + $0x148] sm:$0xf] }
 0x2f1   : > { %2810 = vmatmul.mubr.msk.f32.gmra.mrb[2].mxu1 %vm293_vm7, %v2805_v32  ;;  %v3170_v38 = vpop.permute.xlu0 %3169  ;;  %v853_v39 = vpop.permute.xlu1 %852  ;;  %938 = vmatprep.mubr.f32.mxu0 %v3210_v10  ;;  %v2864_v45 = vpack.c.bf16 %v980_v41, %v979_v33  ;;  %v2747_v33 = vld [vmem:[%s3861_s2 + $0x60] sm:$0xff] }
 0x2f2   : > { %v856_v43 = vsel %vm255_vm2, %v851_v61, %v853_v39  ;;  %2734 = vmatprep.subr.msk.mxu0 %vm339_vm6, %v853_v39  ;;  %2197 = vmatprep.mubr.f32.mxu1 %v3210_v10  ;;  %v3172_v48 = vunpack.i.h.bf16 %v3170_v38  ;;  %v3171_v18 = vunpack.i.l.bf16 %v3170_v38  ;;  %vm2364_vm2 = vcmask 932864   ;;  %v2827_v38 = vld [vmem:[%s3861_s2 + $0x150] sm:$0xff] }
 0x2f3   : > { %2735 = vmatpush1.msk.msra.mxu0 %vm339_vm6, %v856_v43  ;;  %v2366_v0 = vsel %vm2364_vm2, %v3176_v54, %v3177_v53  ;;  %v2835_v43 = vld [vmem:[%s3861_s2 + $0x168] sm:$0xff] }
 0x2f4   : > { %2736 = vmatmul.mubr.msk.f32.vlgmr.msra.gmra.mrb[30].mxu0 %vm293_vm7, %v2731_v40  ;;  %2863 = vmatprep.subr.bf16.mxu0 %v2862_v42  ;;  %v2906_v13 = vpack.c.bf16 %v3177_v53, %v3172_v48  ;;  %v2365_v57 = vsel %vm2364_vm2, %v3171_v18, %v3172_v48  ;;  %v2748_v40 = vld [vmem:[%s3861_s2 + $0x68] sm:$0xff]  ;;  %v2828_v42 = vld [vmem:[%s3861_s2 + $0x158] sm:$0xff] }
 0x2f5   : > { %2816 = vmatmul.mubr.msk.f32.vlgmr.msra.gmra.mrb[4].mxu1 %vm293_vm7, %v2811_v44  ;;  %v976_v49 = vpop.permute.xlu0 %975  ;;  %v2237_v50 = vpop.permute.xlu1 %2236  ;;  %2865 = vmatpush1.bf16.msra.mxu0 %v2864_v45  ;;  %v2908_v1 = vpack.c.bf16 %v2366_v0, %v2365_v57  ;;  %v2836_v44 = vld [vmem:[%s3861_s2 + $0x170] sm:$0xff]  ;;  %v2837_v45 = vld [vmem:[%s3861_s2 + $0x178] sm:$0xf] }
 0x2f6   : > { %2905 = vmatpush1.bf16.msra.mxu1 %v2904_v47  ;;  %944 = vmatprep.mubr.f32.mxu0 %v3210_v10  ;;  %v2241_v14 = vsel %vm2238_vm12, %v2235_v7, %v2237_v50  ;;  %v2740_v7 = vld [vmem:[%s3861_s2 + $0x50] sm:$0xff] }
 0x2f7   : > { %2822 = vmatprep.subr.msk.mxu1 %vm339_vm6, %v2237_v50  ;;  %2203 = vmatprep.mubr.f32.mxu1 %v3210_v10 }
 0x2f8   : > { %2737 = vmatmul.mubr.msk.f32.gmra.mrb[32].mxu0 %vm293_vm7, %v2732_v51 }
 0x2f9   : > { %2817 = vmatmul.mubr.msk.f32.gmra.mrb[0].mxu1 %vm293_vm7, %v2812_v52  ;;  %v2361_v17 = vpop.permute.xlu0 %2360  ;;  %v3185_v21 = vpop.permute.xlu1 %3184  ;;  %950 = vmatprep.mubr.f32.mxu0 %v3210_v10 }
 0x2fa   : > { %2823 = vmatpush1.msk.msra.mxu1 %vm339_vm6, %v2241_v14  ;;  %2209 = vmatprep.mubr.f32.mxu1 %v3210_v10  ;;  %v3187_v55 = vunpack.i.h.bf16 %v3185_v21  ;;  %v3186_v56 = vunpack.i.l.bf16 %v3185_v21 }
 0x2fb   : > { %2907 = vmatprep.subr.bf16.mxu1 %v2906_v13 }
 0x2fc   : > { %2738 = vmatmul.mubr.msk.f32.gmra.mrb[34].mxu0 %vm293_vm7, %v2733_v22  ;;  %v1106_v2 = vsel %vm1104_vm13, %v3186_v56, %v3187_v55 }
 0x2fd   : > { %2818 = vmatmul.mubr.msk.f32.gmra.mrb[2].mxu1 %vm293_vm7, %v2813_v23  ;;  %v3180_v58 = vpop.permute.xlu0 %3179  ;;  %v978_v59 = vpop.permute.xlu1 %977  ;;  %1063 = vmatprep.mubr.f32.mxu0 %v3210_v10 }
 0x2fe   : > { %v3182_v60 = vunpack.i.h.bf16 %v3180_v58  ;;  %v3181_v61 = vunpack.i.l.bf16 %v3180_v58  ;;  %v981_v62 = vsel %vm265_vm1, %v976_v49, %v978_v59  ;;  %2742 = vmatprep.subr.msk.mxu0 %vm339_vm6, %v978_v59  ;;  %2323 = vmatprep.mubr.f32.mxu1 %v3210_v10  ;;  %vm2490_vm1 = vcmask 924672  }
 0x2ff   : > { %2743 = vmatpush1.msk.msra.mxu0 %vm339_vm6, %v981_v62 }
 0x300   : > { %v1105_v3 = vsel %vm1104_vm13, %v3181_v61, %v3182_v60  ;;  %v2866_v4 = vpack.c.bf16 %v3187_v55, %v3182_v60  ;;  %2744 = vmatmul.mubr.msk.f32.vlgmr.msra.gmra.mrb[30].mxu0 %vm293_vm7, %v2739_v20 }
 0x301   : > { %v2868_v5 = vpack.c.bf16 %v1106_v2, %v1105_v3  ;;  %2824 = vmatmul.mubr.msk.f32.vlgmr.msra.gmra.mrb[4].mxu1 %vm293_vm7, %v2819_v63  ;;  %v2363_v6 = vpop.permute.xlu1 %2362  ;;  %1069 = vmatprep.mubr.f32.mxu0 %v3210_v10  ;;  %v3190_v8 = vpop.permute.xlu0 %3189 }
 0x302   : > { %2909 = vmatpush1.bf16.msra.mxu1 %v2908_v1  ;;  %2867 = vmatprep.subr.bf16.mxu0 %v2866_v4  ;;  %v2367_v11 = vsel %vm2364_vm2, %v2361_v17, %v2363_v6  ;;  %v3192_v12 = vunpack.i.h.bf16 %v3190_v8  ;;  %v3191_v15 = vunpack.i.l.bf16 %v3190_v8 }
 0x303   : > { %2830 = vmatprep.subr.msk.mxu1 %vm339_vm6, %v2363_v6  ;;  %2869 = vmatpush1.bf16.msra.mxu0 %v2868_v5 }
 0x304   : > { %2329 = vmatprep.mubr.f32.mxu1 %v3210_v10  ;;  %2745 = vmatmul.mubr.msk.f32.gmra.mrb[32].mxu0 %vm293_vm7, %v2740_v7  ;;  %v2491_v30 = vsel %vm2490_vm1, %v3191_v15, %v3192_v12 }
 0x305   : > { %2825 = vmatmul.mubr.msk.f32.gmra.mrb[0].mxu1 %vm293_vm7, %v2820_v9  ;;  %v3195_v16 = vpop.permute.xlu1 %3194  ;;  %1075 = vmatprep.mubr.f32.mxu0 %v3210_v10  ;;  %v1101_v27 = vpop.permute.xlu0 %1100 }
 0x306   : > { %2831 = vmatpush1.msk.msra.mxu1 %vm339_vm6, %v2367_v11  ;;  %v3197_v24 = vunpack.i.h.bf16 %v3195_v16  ;;  %v3196_v25 = vunpack.i.l.bf16 %v3195_v16  ;;  %2335 = vmatprep.mubr.f32.mxu1 %v3210_v10 }
 0x308   : > { %v2910_v28 = vpack.c.bf16 %v3197_v24, %v3192_v12  ;;  %v2492_v29 = vsel %vm2490_vm1, %v3196_v25, %v3197_v24  ;;  %2746 = vmatmul.mubr.msk.f32.gmra.mrb[34].mxu0 %vm293_vm7, %v2741_v19 }
 0x309   : > { %2826 = vmatmul.mubr.msk.f32.gmra.mrb[2].mxu1 %vm293_vm7, %v2821_v26  ;;  %v1103_v32 = vpop.permute.xlu1 %1102  ;;  %1189 = vmatprep.mubr.f32.mxu0 %v3210_v10  ;;  %v2912_v34 = vpack.c.bf16 %v2492_v29, %v2491_v30  ;;  %v2487_v41 = vpop.permute.xlu0 %2486 }
 0x30a   : > { %v1107_v37 = vsel %vm1104_vm13, %v1101_v27, %v1103_v32  ;;  %2750 = vmatprep.subr.msk.mxu0 %vm339_vm6, %v1103_v32  ;;  %2911 = vmatprep.subr.bf16.mxu1 %v2910_v28 }
 0x30b   : > { %2751 = vmatpush1.msk.msra.mxu0 %vm339_vm6, %v1107_v37  ;;  %2449 = vmatprep.mubr.f32.mxu1 %v3210_v10 }
 0x30c   : > { %2752 = vmatmul.mubr.msk.f32.vlgmr.msra.gmra.mrb[30].mxu0 %vm293_vm7, %v2747_v33  ;;  %2871 = vmatprep.subr.bf16.mxu0 %v3476_v31 }
 0x30d   : > { %2832 = vmatmul.mubr.msk.f32.vlgmr.msra.gmra.mrb[4].mxu1 %vm293_vm7, %v2827_v38  ;;  %v2489_v39 = vpop.permute.xlu1 %2488  ;;  %2873 = vmatpush1.bf16.msra.mxu0 %v3482_v36  ;;  %v2829_v36 = vld [vmem:[%s3861_s2 + $0x160] sm:$0xf] }
 0x30e   : > { %2913 = vmatpush1.bf16.msra.mxu1 %v2912_v34  ;;  %2758 = vmatprep.subr.msk.mxu0 %vm339_vm6, %v3480_v35  ;;  %v2493_v31 = vsel %vm2490_vm1, %v2487_v41, %v2489_v39  ;;  %v2749_v35 = vld [vmem:[%s3861_s2 + $0x70] sm:$0xf] }
 0x30f   : > { %2838 = vmatprep.subr.msk.mxu1 %vm339_vm6, %v2489_v39  ;;  %1195 = vmatprep.mubr.f32.mxu0 %v3210_v10 }
 0x310   : > { %2455 = vmatprep.mubr.f32.mxu1 %v3210_v10  ;;  %2753 = vmatmul.mubr.msk.f32.gmra.mrb[32].mxu0 %vm293_vm7, %v2748_v40 }
 0x311   : > { %2833 = vmatmul.mubr.msk.f32.gmra.mrb[0].mxu1 %vm293_vm7, %v2828_v42  ;;  %2759 = vmatpush1.msk.msra.mxu0 %vm339_vm6, %v3499_v46  ;;  %v2755_v46 = vld [vmem:[%s3861_s2 + $0x78] sm:$0xff] }
 0x312   : > { %2839 = vmatpush1.msk.msra.mxu1 %vm339_vm6, %v2493_v31  ;;  %1201 = vmatprep.mubr.f32.mxu0 %v3210_v10  ;;  %vm2631_vm6 = vcmask 457728  }
 0x313   : > { %2461 = vmatprep.mubr.f32.mxu1 %v3210_v10 }
 0x314   : > { %2754 = vmatmul.mubr.msk.f32.gmra.mrb[34].mxu0 %vm293_vm7, %v2749_v35 }
 0x315   : > { %2834 = vmatmul.mubr.msk.f32.gmra.mrb[2].mxu1 %vm293_vm7, %v2829_v36  ;;  %1315 = vmatprep.mubr.f32.mxu0 %v3210_v10 }
 0x316   : > { %2575 = vmatprep.mubr.f32.mxu1 %v3210_v10 }
 0x318   : > { %2760 = vmatmul.mubr.msk.f32.vlgmr.msra.gmra.mrb[30].mxu0 %vm293_vm7, %v2755_v46 }
 0x319   : > { %2840 = vmatmul.mubr.msk.f32.vlgmr.msra.gmra.mrb[4].mxu1 %vm293_vm7, %v2835_v43 }
 0x31a   : > { %2581 = vmatprep.mubr.f32.mxu1 %v3210_v10  ;;  %v2606_v52 = vpop.permute.xlu0 %2605 }
 0x31d   : > { %2841 = vmatmul.mubr.msk.f32.gmra.mrb[0].mxu1 %vm293_vm7, %v2836_v44 }
 0x31e   : > { %2587 = vmatprep.mubr.f32.mxu1 %v3210_v10  ;;  %v2611_v23 = vpop.permute.xlu1 %2610 }
 0x321   : > { %2842 = vmatmul.mubr.msk.f32.gmra.mrb[2].mxu1 %vm293_vm7, %v2837_v45  ;;  %vm2636_vm7 = vcmask 453632  }
 0x322   : > { %v2616_v2 = vpop.permute.xlu1 %2615 }
 0x3e3   : > { %v1197_v47 = vpop.f32.mrb[32].mxu0 }
 0x3e4   : > { %v1199_v48 = vpop.f32.mrb[33].mxu0 }
 0x3e7   : > { %v1203_v49 = vpop.f32.mrb[34].mxu0 }
 0x3e8   : > { %v1205_v50 = vpop.f32.mrb[35].mxu0 }
 0x3eb   : > { %v1317_v51 = vpop.f32.mrb[30].mxu0 }
 0x3ec   : > { %v2577_v53 = vpop.f32.mrb[4].mxu1  ;;  %v1319_v14 = vpop.f32.mrb[31].mxu0 }
 0x3ed   : > { %v2918_v18 = vadd.f32 %v2577_v53, %v1317_v51  ;;  %v2579_v13 = vpop.f32.mrb[5].mxu1 }
 0x3ee   : > { %v2919_v17 = vadd.f32 %v2579_v13, %v1319_v14 }
 0x3ef   : > { %v2618_v21 = vadd.f32 %v2918_v18, %v2606_v52 }
 0x3f0   : > { %v2619_v10 = vadd.f32 %v2919_v17, %v2606_v52  ;;  %v2583_v22 = vpop.f32.mrb[0].mxu1 }
 0x3f1   : > { %v2624_v54 = vmax.f32 %v2618_v21, 0.0  ;;  %v2920_v55 = vadd.f32 %v2583_v22, %v1197_v47  ;;  %v2585_v56 = vpop.f32.mrb[1].mxu1 }
 0x3f2   : > { %v2625_v57 = vmax.f32 %v2619_v10, 0.0  ;;  %v2921_v58 = vadd.f32 %v2585_v56, %v1199_v48 }
 0x3f3   : > { %2630 = vst [vmem:[%s224_s28] sm:$0xff] %v2624_v54  ;;  %v2620_v59 = vadd.f32 %v2920_v55, %v2611_v23 }
 0x3f4   : > { %2632 = vst.msk [vmem:[%s224_s28 + $0x8] sm:$0xff] %vm2631_vm6, %v2625_v57  ;;  %v2621_v20 = vadd.f32 %v2921_v58, %v2611_v23  ;;  %v2589_v60 = vpop.f32.mrb[2].mxu1 }
 0x3f5   : > { %v2626_v61 = vmax.f32 %v2620_v59, 0.0  ;;  %v2922_v62 = vadd.f32 %v2589_v60, %v1203_v49  ;;  %v2591_v63 = vpop.f32.mrb[3].mxu1 }
 0x3f6   : > { %v2627_v0 = vmax.f32 %v2621_v20, 0.0  ;;  %v2923_v1 = vadd.f32 %v2591_v63, %v1205_v50 }
 0x3f7   : > { %2633 = vst [vmem:[%s224_s28 + $0x10] sm:$0xff] %v2626_v61  ;;  %v2622_v3 = vadd.f32 %v2922_v62, %v2616_v2 }
 0x3f8   : > { %2634 = vst.msk [vmem:[%s224_s28 + $0x18] sm:$0xff] %vm2631_vm6, %v2627_v0  ;;  %v2623_v4 = vadd.f32 %v2923_v1, %v2616_v2 }
 0x3f9   : > { %v2628_v5 = vmax.f32 %v2622_v3, 0.0 }
 0x3fa   : > { %v2629_v6 = vmax.f32 %v2623_v4, 0.0 }
 0x3fb   : > { %2635 = vst [vmem:[%s224_s28 + $0x20] sm:$0xf] %v2628_v5 }
 0x3fc   : > { %2637 = vst.msk [vmem:[%s224_s28 + $0x28] sm:$0xf] %vm2636_vm7, %v2629_v6 }
 0x3fd PF: > { %s15_s18 = sadd.s32 1, %s3206_s18  }
 0x3fe   : > { %p12_p4 = scmp.ge.s32.totalorder %s15_s18, 4  }
 0x400   :  { %14 = sbr.rel (!%p12_p4) target bundleno = 1 (0x1), region = 85 }

</bundles_post_ra>
